<compile_context>
chip_gen: v5e
topology: v5e:2x2
jax: 0.10.0
libtpu: 0.0.40
codegen_flags: <defaults>
</compile_context>

<pallas_src>
import jax
import jax.numpy as jnp
from jax import lax
from jax.experimental import pallas as pl
from jax.experimental.pallas import tpu as pltpu

NEG_SLOPE = 0.01  # torch.nn.functional.leaky_relu default negative_slope


def _leaky(x):
    return jnp.where(x >= 0, x, NEG_SLOPE * x)


def _l2norm(x):
    # F.normalize(x, p=2, dim=1, eps=1e-12) == x / max(||x||, 1e-12)
    ss = jnp.sum(x * x, axis=-1, keepdims=True)
    return x * lax.rsqrt(jnp.maximum(ss, 1e-24))


def _full_spec(shape):
    # single whole-array block, grid=()
    return pl.BlockSpec(shape, lambda: (0,) * len(shape))


def _vmem_limit_bytes():
    # Generation-aware scoped-VMEM budget (~3/4 of physical VMEM:
    # ~96 MiB on v5e/v6e, ~48 MiB on v7x); fallback if the query is unavailable.
    try:
        cap = int(pltpu.get_tpu_info().vmem_capacity_bytes)
    except Exception:
        cap = 128 * 1024 * 1024
    return (cap * 3) // 4


# ----------------------------- fused GRCN kernel ------------------------------

def _make_grcn_kernel(num_user, num_item, dim_c, dim_e, num_routing):
    # Alignment contract: keeps every row/lane slice on (8, 128) tile
    # boundaries.  TODO(synk): pad user/item counts and feature dims in the
    # wrapper when real data violates this.
    assert dim_c % 128 == 0 and dim_e % 128 == 0
    assert num_user % 8 == 0 and num_item % 8 == 0
    C, U = dim_c, num_user
    f32, bf16 = jnp.float32, jnp.bfloat16

    def kernel(vfeat_ref, tfeat_ref, wv_ref, bv_ref, prefv_ref,
               wt_ref, bt_ref, preft_ref, id_ref, conf_ref,
               ssrc_u_ref, ssrc_i_ref, sdst_u_ref, sdst_i_ref, out_ref):
        # Directed one-hot operators split by node type (bf16 MXU operands).
        ssrc_u, ssrc_i = ssrc_u_ref[...], ssrc_i_ref[...]
        sdst_u, sdst_i = sdst_u_ref[...], sdst_i_ref[...]

        lane2c = lax.broadcasted_iota(jnp.int32, (1, 2 * C), 1)   # modality mask
        lane128 = lax.broadcasted_iota(jnp.int32, (1, 128), 1)    # aux-column mask

        def per_modality_scale(x, sv, st):
            # multiply the v half of the fused [v | t] lane layout by sv, t by st
            sel = jnp.broadcast_to(lane2c < C, x.shape)
            return x * jnp.where(sel, jnp.broadcast_to(sv, x.shape),
                                 jnp.broadcast_to(st, x.shape))

        def l2norm_per_modality(x):
            nv = jnp.sum(jnp.square(x[:, :C]), axis=-1, keepdims=True)
            nt = jnp.sum(jnp.square(x[:, C:]), axis=-1, keepdims=True)
            return per_modality_scale(x, lax.rsqrt(jnp.maximum(nv, 1e-24)),
                                      lax.rsqrt(jnp.maximum(nt, 1e-24)))

        def aux_block(cols):
            # (rows, 128) block whose lane k holds cols[k], zeros elsewhere.
            # Lets narrow per-edge / per-node scalars ride inside a lane-aligned
            # 128-wide block of the same MXU pass instead of separate width-1
            # dots (which would stream the one-hot operand again).
            rows = cols[0].shape[0]
            shape = (rows, 128)
            out = jnp.zeros(shape, f32)
            lane = jnp.broadcast_to(lane128, shape)
            for k, c in enumerate(cols):
                out = jnp.where(lane == k, jnp.broadcast_to(c, shape), out)
            return out

        def gat_logits(xi, xj):
            # rows of x are L2-normalized -> |<x_i, x_j>| <= 1, so exp() cannot
            # overflow and torch_geometric softmax's max-subtraction is skipped.
            p = xi * xj
            ev = jnp.exp(jnp.sum(p[:, :C], axis=-1, keepdims=True))
            et = jnp.exp(jnp.sum(p[:, C:], axis=-1, keepdims=True))
            return ev, et

        def gat_rhs(xj, ev, et):
            # fused scatter RHS: [x_j * e | e_v e_t 0...0]   -> (E, 2C + 128)
            msgs = per_modality_scale(xj, ev, et)
            return jnp.concatenate([msgs, aux_block((ev, et))],
                                   axis=-1).astype(bf16)

        def scatter(onehot, rhs):
            # one_hot^T @ rhs : add-scatter to destination nodes (f32 accum)
            return lax.dot_general(onehot, rhs, (((0,), (0,)), ((), ())),
                                   preferred_element_type=f32)

        def split_agg(sc):
            # per-node softmax normalization per modality (EUP reciprocal)
            inv_v = pl.reciprocal(sc[:, 2 * C:2 * C + 1] + 1e-16, approx=True)
            inv_t = pl.reciprocal(sc[:, 2 * C + 1:2 * C + 2] + 1e-16, approx=True)
            return per_modality_scale(sc[:, :2 * C], inv_v, inv_t), inv_v, inv_t

        # ------------- CGCN (both modalities fused, lane layout [v | t]) -------
        fv = _l2norm(_leaky(jnp.dot(vfeat_ref[...], wv_ref[...],
                                    preferred_element_type=f32) + bv_ref[...]))
        ft = _l2norm(_leaky(jnp.dot(tfeat_ref[...], wt_ref[...],
                                    preferred_element_type=f32) + bt_ref[...]))
        feats = jnp.concatenate([fv, ft], axis=-1)                    # (I, 2C)
        pref = jnp.concatenate([_l2norm(prefv_ref[...]),
                                _l2norm(preft_ref[...])], axis=-1)    # (U, 2C)

        feats_bf = feats.astype(bf16)
        # item rows never change across routing: hoist their edge gathers
        xj_item = jnp.dot(ssrc_i, feats_bf, preferred_element_type=f32)  # (E,2C)
        xi_item = jnp.dot(sdst_i, feats_bf, preferred_element_type=f32)  # (E,2C)

        def edge_gather(pref_now):
            pb = pref_now.astype(bf16)
            xj = jnp.dot(ssrc_u, pb, preferred_element_type=f32) + xj_item
            xi = jnp.dot(sdst_u, pb, preferred_element_type=f32) + xi_item
            return xj, xi

        # routing loop (small static unroll; switch to lax.fori_loop carrying
        # `pref` if num_routing grows beyond ~3)
        for _ in range(num_routing):
            xj, xi = edge_gather(pref)
            ev, et = gat_logits(xi, xj)
            # only user rows of the aggregation are consumed by the reference
            agg_u, _, _ = split_agg(scatter(sdst_u, gat_rhs(xj, ev, et)))
            pref = l2norm_per_modality(pref + agg_u)

        # final GAT pass on the bidirectional edge set, expressed with the
        # directed operators (a reversed edge swaps src<->dst and shares the
        # forward edge's logit, so e_v/e_t are computed once for E edges)
        xj, xi = edge_gather(pref)
        ev, et = gat_logits(xi, xj)
        rhs_fwd = gat_rhs(xj, ev, et)     # forward-edge messages -> dst nodes
        rhs_rev = gat_rhs(xi, ev, et)     # reversed-edge messages -> src nodes

        agg_u, invu_v, invu_t = split_agg(scatter(sdst_u, rhs_fwd) +
                                          scatter(ssrc_u, rhs_rev))
        agg_i, invi_v, invi_t = split_agg(scatter(sdst_i, rhs_fwd) +
                                          scatter(ssrc_i, rhs_rev))
        rep_u = pref + _leaky(agg_u)      # (U, 2C) == [v_rep | t_rep] user rows
        rep_i = feats + _leaky(agg_i)     # (I, 2C) == [v_rep | t_rep] item rows

        # ------------- EGCN + 'confid' edge weights ---------------------------
        x_id = _l2norm(id_ref[...])                                   # (N, dim_E)
        conf = conf_ref[...]                                          # (N, 2)

        def augmented(xb, cb, iv, it):
            # [id features | conf_v conf_t inv_den_v inv_den_t 0...0]; the
            # confidence / inverse-denominator gathers ride in the same MXU pass
            # as the hop-1 feature gather (no separate width-1 gathers).
            aux = aux_block((cb[:, 0:1], cb[:, 1:2], iv, it))
            return jnp.concatenate([xb, aux], axis=-1).astype(bf16)

        aug_u = augmented(x_id[:U], conf[:U], invu_v, invu_t)    # (U, dim_E+128)
        aug_i = augmented(x_id[U:], conf[U:], invi_v, invi_t)    # (I, dim_E+128)

        def gather_nodes(mat_u, mat_i, hu, hi):
            return (jnp.dot(mat_u, hu, preferred_element_type=f32) +
                    jnp.dot(mat_i, hi, preferred_element_type=f32))

        g_src = gather_nodes(ssrc_u, ssrc_i, aug_u, aug_i)       # (E, dim_E+128)
        g_dst = gather_nodes(sdst_u, sdst_i, aug_u, aug_i)       # (E, dim_E+128)

        def cols(g, k):
            return g[:, dim_e + k:dim_e + k + 1]

        # weight_mode='confid' + pruning: per bidirectional edge
        #   w = relu(max_m(alpha_m * conf_m[source of the bidirectional edge]))
        # with alpha_m = e_m / den_m[destination of the bidirectional edge].
        w_fwd = jnp.maximum(jnp.maximum(ev * cols(g_dst, 2) * cols(g_src, 0),
                                        et * cols(g_dst, 3) * cols(g_src, 1)), 0.0)
        w_rev = jnp.maximum(jnp.maximum(ev * cols(g_src, 2) * cols(g_dst, 0),
                                        et * cols(g_src, 3) * cols(g_dst, 1)), 0.0)

        def sage_hop(h_src, h_dst):
            # SAGEConv(aggr='add') + leaky_relu over the bidirectional edges
            mf = (h_src * w_fwd).astype(bf16)
            mr = (h_dst * w_rev).astype(bf16)
            agg_user = scatter(sdst_u, mf) + scatter(ssrc_u, mr)
            agg_item = scatter(sdst_i, mf) + scatter(ssrc_i, mr)
            return _leaky(agg_user), _leaky(agg_item)

        x1_u, x1_i = sage_hop(g_src[:, :dim_e], g_dst[:, :dim_e])
        x1_ub, x1_ib = x1_u.astype(bf16), x1_i.astype(bf16)
        x2_u, x2_i = sage_hop(gather_nodes(ssrc_u, ssrc_i, x1_ub, x1_ib),
                              gather_nodes(sdst_u, sdst_i, x1_ub, x1_ib))

        id_u = x_id[:U] + x1_u + x2_u
        id_i = x_id[U:] + x1_i + x2_i

        # fusion_mode='concat': [id_rep | v_rep | t_rep] (all slices 8/128-aligned)
        out_ref[:U, :dim_e] = id_u
        out_ref[U:, :dim_e] = id_i
        out_ref[:U, dim_e:] = rep_u
        out_ref[U:, dim_e:] = rep_i

    return kernel


# ------------------------------ model forward ---------------------------------

def grcn_forward(params, v_feat, t_feat, src, dst, num_user, num_item,
                 num_routing):
    # dropout_adj with p=0.0 is the identity; bipartite user->item edges contain
    # no self loops, so remove_self_loops is a no-op.
    dim_c = params["v"]["mlp_w"].shape[1]
    dim_e = params["id_embedding"].shape[1]
    n = num_user + num_item

    # Directed one-hot gather/scatter operators split by node type; the
    # bidirectional passes reuse them with src/dst swapped, so only the
    # directed set is ever materialised (no ssrc_b/sdst_b).
    # TODO(synk): at real graph sizes replace with scalar-prefetched edge
    # indices (PrefetchScalarGridSpec) + an edge-tiled grid ('parallel' node
    # tiles for v7x megacore); dense one-hots are O(E*N) and kept only for
    # compile-robustness at toy validation scale.
    ssrc_u = jax.nn.one_hot(src, num_user, dtype=jnp.bfloat16)
    ssrc_i = jax.nn.one_hot(src - num_user, num_item, dtype=jnp.bfloat16)
    sdst_u = jax.nn.one_hot(dst, num_user, dtype=jnp.bfloat16)
    sdst_i = jax.nn.one_hot(dst - num_user, num_item, dtype=jnp.bfloat16)

    inputs = (v_feat, t_feat,
              params["v"]["mlp_w"], params["v"]["mlp_b"], params["v"]["preference"],
              params["t"]["mlp_w"], params["t"]["mlp_b"], params["t"]["preference"],
              params["id_embedding"], params["model_specific_conf"],
              ssrc_u, ssrc_i, sdst_u, sdst_i)

    kernel = _make_grcn_kernel(num_user, num_item, dim_c, dim_e, num_routing)
    return pl.pallas_call(
        kernel,
        out_shape=jax.ShapeDtypeStruct((n, dim_e + 2 * dim_c), jnp.float32),
        in_specs=[_full_spec(x.shape) for x in inputs],
        out_specs=_full_spec((n, dim_e + 2 * dim_c)),
        compiler_params=pltpu.CompilerParams(
            vmem_limit_bytes=_vmem_limit_bytes()),
    )(*inputs)


# ---------------------------------- main ---------------------------------------

def _xavier_normal(key, shape):
    fan_in, fan_out = shape
    std = (2.0 / (fan_in + fan_out)) ** 0.5
    return std * jax.random.normal(key, shape, dtype=jnp.float32)


if __name__ == "__main__":
    num_user, num_item = 8, 8          # multiples of 8 -> sublane-aligned slices
    N = num_user + num_item
    dim_E, dim_C = 128, 128            # lane-dense feature widths
    dim_v, dim_t = 128, 256
    E = 24
    num_routing = 2

    key = jax.random.PRNGKey(0)
    ks = jax.random.split(key, 10)

    # synthetic modality features (rows = items)
    v_feat = jax.random.normal(ks[0], (num_item, dim_v), dtype=jnp.float32)
    t_feat = jax.random.normal(ks[1], (num_item, dim_t), dtype=jnp.float32)

    # directed user -> item edges (item ids offset by num_user), as in the GRCN
    # datasets; the kernel itself makes no assumption about edge direction.
    edge_src = jax.random.randint(ks[2], (E,), 0, num_user)
    edge_dst = jax.random.randint(ks[3], (E,), num_user, N)

    params = {
        "v": {"preference": _xavier_normal(ks[4], (num_user, dim_C)),
              "mlp_w": _xavier_normal(ks[5], (dim_v, dim_C)),
              "mlp_b": jnp.zeros((1, dim_C), jnp.float32)},
        "t": {"preference": _xavier_normal(ks[6], (num_user, dim_C)),
              "mlp_w": _xavier_normal(ks[7], (dim_t, dim_C)),
              "mlp_b": jnp.zeros((1, dim_C), jnp.float32)},
        "id_embedding": _xavier_normal(ks[8], (N, dim_E)),
        "model_specific_conf": _xavier_normal(ks[9], (N, 2)),
    }

    representation = grcn_forward(params, v_feat, t_feat, edge_src, edge_dst,
                                  num_user, num_item, num_routing)
    representation = jax.block_until_ready(representation)

    assert representation.shape == (N, dim_E + 2 * dim_C)
    assert bool(jnp.all(jnp.isfinite(representation)))
    print("KERNEL_OK")
</pallas_src>

<mosaic_0001>
module attributes {stable_mosaic.version = 11 : i64} {
  func.func @kernel(%arg0: memref<8x128xf32, #tpu.memory_space<vmem>>, %arg1: memref<8x256xf32, #tpu.memory_space<vmem>>, %arg2: memref<128x128xf32, #tpu.memory_space<vmem>>, %arg3: memref<1x128xf32, #tpu.memory_space<vmem>>, %arg4: memref<8x128xf32, #tpu.memory_space<vmem>>, %arg5: memref<256x128xf32, #tpu.memory_space<vmem>>, %arg6: memref<1x128xf32, #tpu.memory_space<vmem>>, %arg7: memref<8x128xf32, #tpu.memory_space<vmem>>, %arg8: memref<16x128xf32, #tpu.memory_space<vmem>>, %arg9: memref<16x2xf32, #tpu.memory_space<vmem>>, %arg10: memref<24x8xbf16, #tpu.memory_space<vmem>>, %arg11: memref<24x8xbf16, #tpu.memory_space<vmem>>, %arg12: memref<24x8xbf16, #tpu.memory_space<vmem>>, %arg13: memref<24x8xbf16, #tpu.memory_space<vmem>>, %arg14: memref<16x384xf32, #tpu.memory_space<vmem>>) attributes {dimension_semantics = [], scalar_prefetch = 0 : i64, scratch_operands = 0 : i64, tpu.core_type = #tpu.core_type<tc>} {
    %c0 = arith.constant 0 : index
    %c0_0 = arith.constant 0 : index
    %0 = vector.load %arg10[%c0, %c0_0] : memref<24x8xbf16, #tpu.memory_space<vmem>>, vector<24x8xbf16>
    %c0_1 = arith.constant 0 : index
    %c0_2 = arith.constant 0 : index
    %1 = vector.load %arg11[%c0_1, %c0_2] : memref<24x8xbf16, #tpu.memory_space<vmem>>, vector<24x8xbf16>
    %c0_3 = arith.constant 0 : index
    %c0_4 = arith.constant 0 : index
    %2 = vector.load %arg12[%c0_3, %c0_4] : memref<24x8xbf16, #tpu.memory_space<vmem>>, vector<24x8xbf16>
    %c0_5 = arith.constant 0 : index
    %c0_6 = arith.constant 0 : index
    %3 = vector.load %arg13[%c0_5, %c0_6] : memref<24x8xbf16, #tpu.memory_space<vmem>>, vector<24x8xbf16>
    %4 = tpu.iota {dimensions = array<i32: 1>} : vector<1x256xi32>
    %5 = tpu.iota {dimensions = array<i32: 1>} : vector<1x128xi32>
    %c0_7 = arith.constant 0 : index
    %c0_8 = arith.constant 0 : index
    %6 = vector.load %arg0[%c0_7, %c0_8] : memref<8x128xf32, #tpu.memory_space<vmem>>, vector<8x128xf32>
    %c0_9 = arith.constant 0 : index
    %c0_10 = arith.constant 0 : index
    %7 = vector.load %arg2[%c0_9, %c0_10] : memref<128x128xf32, #tpu.memory_space<vmem>>, vector<128x128xf32>
    %cst = arith.constant dense<0.000000e+00> : vector<8x128xf32>
    %8 = tpu.matmul %6, %7, %cst {dimension_numbers = #tpu.dot_dimension_numbers<[1], [0], [0], [1], [0, 0, 1, 1], [], []>} : vector<8x128xf32>, vector<128x128xf32>, vector<8x128xf32> -> vector<8x128xf32>
    %c0_11 = arith.constant 0 : index
    %c0_12 = arith.constant 0 : index
    %9 = vector.load %arg3[%c0_11, %c0_12] : memref<1x128xf32, #tpu.memory_space<vmem>>, vector<1x128xf32>
    %10 = vector.broadcast %9 : vector<1x128xf32> to vector<8x128xf32>
    %11 = arith.addf %8, %10 : vector<8x128xf32>
    %cst_13 = arith.constant 0.000000e+00 : f32
    %12 = vector.broadcast %cst_13 : f32 to vector<8x128xf32>
    %13 = arith.cmpf oge, %11, %12 : vector<8x128xf32>
    %cst_14 = arith.constant 0.00999999977 : f32
    %14 = vector.broadcast %cst_14 : f32 to vector<8x128xf32>
    %15 = arith.mulf %14, %11 : vector<8x128xf32>
    %16 = arith.select %13, %11, %15 : vector<8x128xi1>, vector<8x128xf32>
    %17 = arith.mulf %16, %16 : vector<8x128xf32>
    %cst_15 = arith.constant dense<0.000000e+00> : vector<8xf32>
    %18 = vector.multi_reduction <add>, %17, %cst_15 [1] : vector<8x128xf32> to vector<8xf32>
    %19 = vector.shape_cast %18 : vector<8xf32> to vector<8x1xf32>
    %cst_16 = arith.constant 1.000000e-24 : f32
    %20 = vector.broadcast %cst_16 : f32 to vector<8x1xf32>
    %21 = arith.maximumf %19, %20 : vector<8x1xf32>
    %22 = math.rsqrt %21 : vector<8x1xf32>
    %23 = vector.broadcast %22 : vector<8x1xf32> to vector<8x128xf32>
    %24 = arith.mulf %16, %23 : vector<8x128xf32>
    %c0_17 = arith.constant 0 : index
    %c0_18 = arith.constant 0 : index
    %25 = vector.load %arg1[%c0_17, %c0_18] : memref<8x256xf32, #tpu.memory_space<vmem>>, vector<8x256xf32>
    %c0_19 = arith.constant 0 : index
    %c0_20 = arith.constant 0 : index
    %26 = vector.load %arg5[%c0_19, %c0_20] : memref<256x128xf32, #tpu.memory_space<vmem>>, vector<256x128xf32>
    %cst_21 = arith.constant dense<0.000000e+00> : vector<8x128xf32>
    %27 = tpu.matmul %25, %26, %cst_21 {dimension_numbers = #tpu.dot_dimension_numbers<[1], [0], [0], [1], [0, 0, 1, 1], [], []>} : vector<8x256xf32>, vector<256x128xf32>, vector<8x128xf32> -> vector<8x128xf32>
    %c0_22 = arith.constant 0 : index
    %c0_23 = arith.constant 0 : index
    %28 = vector.load %arg6[%c0_22, %c0_23] : memref<1x128xf32, #tpu.memory_space<vmem>>, vector<1x128xf32>
    %29 = vector.broadcast %28 : vector<1x128xf32> to vector<8x128xf32>
    %30 = arith.addf %27, %29 : vector<8x128xf32>
    %cst_24 = arith.constant 0.000000e+00 : f32
    %31 = vector.broadcast %cst_24 : f32 to vector<8x128xf32>
    %32 = arith.cmpf oge, %30, %31 : vector<8x128xf32>
    %cst_25 = arith.constant 0.00999999977 : f32
    %33 = vector.broadcast %cst_25 : f32 to vector<8x128xf32>
    %34 = arith.mulf %33, %30 : vector<8x128xf32>
    %35 = arith.select %32, %30, %34 : vector<8x128xi1>, vector<8x128xf32>
    %36 = arith.mulf %35, %35 : vector<8x128xf32>
    %cst_26 = arith.constant dense<0.000000e+00> : vector<8xf32>
    %37 = vector.multi_reduction <add>, %36, %cst_26 [1] : vector<8x128xf32> to vector<8xf32>
    %38 = vector.shape_cast %37 : vector<8xf32> to vector<8x1xf32>
    %cst_27 = arith.constant 1.000000e-24 : f32
    %39 = vector.broadcast %cst_27 : f32 to vector<8x1xf32>
    %40 = arith.maximumf %38, %39 : vector<8x1xf32>
    %41 = math.rsqrt %40 : vector<8x1xf32>
    %42 = vector.broadcast %41 : vector<8x1xf32> to vector<8x128xf32>
    %43 = arith.mulf %35, %42 : vector<8x128xf32>
    %44 = tpu.concatenate %24, %43 in 1 : vector<8x128xf32>, vector<8x128xf32> -> vector<8x256xf32>
    %c0_28 = arith.constant 0 : index
    %c0_29 = arith.constant 0 : index
    %45 = vector.load %arg4[%c0_28, %c0_29] : memref<8x128xf32, #tpu.memory_space<vmem>>, vector<8x128xf32>
    %46 = arith.mulf %45, %45 : vector<8x128xf32>
    %cst_30 = arith.constant dense<0.000000e+00> : vector<8xf32>
    %47 = vector.multi_reduction <add>, %46, %cst_30 [1] : vector<8x128xf32> to vector<8xf32>
    %48 = vector.shape_cast %47 : vector<8xf32> to vector<8x1xf32>
    %cst_31 = arith.constant 1.000000e-24 : f32
    %49 = vector.broadcast %cst_31 : f32 to vector<8x1xf32>
    %50 = arith.maximumf %48, %49 : vector<8x1xf32>
    %51 = math.rsqrt %50 : vector<8x1xf32>
    %52 = vector.broadcast %51 : vector<8x1xf32> to vector<8x128xf32>
    %53 = arith.mulf %45, %52 : vector<8x128xf32>
    %c0_32 = arith.constant 0 : index
    %c0_33 = arith.constant 0 : index
    %54 = vector.load %arg7[%c0_32, %c0_33] : memref<8x128xf32, #tpu.memory_space<vmem>>, vector<8x128xf32>
    %55 = arith.mulf %54, %54 : vector<8x128xf32>
    %cst_34 = arith.constant dense<0.000000e+00> : vector<8xf32>
    %56 = vector.multi_reduction <add>, %55, %cst_34 [1] : vector<8x128xf32> to vector<8xf32>
    %57 = vector.shape_cast %56 : vector<8xf32> to vector<8x1xf32>
    %cst_35 = arith.constant 1.000000e-24 : f32
    %58 = vector.broadcast %cst_35 : f32 to vector<8x1xf32>
    %59 = arith.maximumf %57, %58 : vector<8x1xf32>
    %60 = math.rsqrt %59 : vector<8x1xf32>
    %61 = vector.broadcast %60 : vector<8x1xf32> to vector<8x128xf32>
    %62 = arith.mulf %54, %61 : vector<8x128xf32>
    %63 = tpu.concatenate %53, %62 in 1 : vector<8x128xf32>, vector<8x128xf32> -> vector<8x256xf32>
    %64 = arith.truncf %44 : vector<8x256xf32> to vector<8x256xbf16>
    %cst_36 = arith.constant dense<0.000000e+00> : vector<24x256xf32>
    %65 = tpu.matmul %1, %64, %cst_36 {dimension_numbers = #tpu.dot_dimension_numbers<[1], [0], [0], [1], [0, 0, 1, 1], [], []>} : vector<24x8xbf16>, vector<8x256xbf16>, vector<24x256xf32> -> vector<24x256xf32>
    %cst_37 = arith.constant dense<0.000000e+00> : vector<24x256xf32>
    %66 = tpu.matmul %3, %64, %cst_37 {dimension_numbers = #tpu.dot_dimension_numbers<[1], [0], [0], [1], [0, 0, 1, 1], [], []>} : vector<24x8xbf16>, vector<8x256xbf16>, vector<24x256xf32> -> vector<24x256xf32>
    %67 = arith.truncf %63 : vector<8x256xf32> to vector<8x256xbf16>
    %cst_38 = arith.constant dense<0.000000e+00> : vector<24x256xf32>
    %68 = tpu.matmul %0, %67, %cst_38 {dimension_numbers = #tpu.dot_dimension_numbers<[1], [0], [0], [1], [0, 0, 1, 1], [], []>} : vector<24x8xbf16>, vector<8x256xbf16>, vector<24x256xf32> -> vector<24x256xf32>
    %69 = arith.addf %68, %65 : vector<24x256xf32>
    %cst_39 = arith.constant dense<0.000000e+00> : vector<24x256xf32>
    %70 = tpu.matmul %2, %67, %cst_39 {dimension_numbers = #tpu.dot_dimension_numbers<[1], [0], [0], [1], [0, 0, 1, 1], [], []>} : vector<24x8xbf16>, vector<8x256xbf16>, vector<24x256xf32> -> vector<24x256xf32>
    %71 = arith.addf %70, %66 : vector<24x256xf32>
    %72 = arith.mulf %71, %69 : vector<24x256xf32>
    %73 = vector.extract_strided_slice %72 {offsets = [0, 0], sizes = [24, 128], strides = [1, 1]} : vector<24x256xf32> to vector<24x128xf32>
    %cst_40 = arith.constant dense<0.000000e+00> : vector<24xf32>
    %74 = vector.multi_reduction <add>, %73, %cst_40 [1] : vector<24x128xf32> to vector<24xf32>
    %75 = vector.shape_cast %74 : vector<24xf32> to vector<24x1xf32>
    %76 = math.exp %75 : vector<24x1xf32>
    %77 = vector.extract_strided_slice %72 {offsets = [0, 128], sizes = [24, 128], strides = [1, 1]} : vector<24x256xf32> to vector<24x128xf32>
    %cst_41 = arith.constant dense<0.000000e+00> : vector<24xf32>
    %78 = vector.multi_reduction <add>, %77, %cst_41 [1] : vector<24x128xf32> to vector<24xf32>
    %79 = vector.shape_cast %78 : vector<24xf32> to vector<24x1xf32>
    %80 = math.exp %79 : vector<24x1xf32>
    %c128_i32 = arith.constant 128 : i32
    %81 = vector.broadcast %c128_i32 : i32 to vector<1x256xi32>
    %82 = arith.cmpi slt, %4, %81 : vector<1x256xi32>
    %83 = vector.shape_cast %82 : vector<1x256xi1> to vector<1x256xi1>
    %84 = vector.broadcast %83 : vector<1x256xi1> to vector<24x256xi1>
    %85 = vector.shape_cast %76 : vector<24x1xf32> to vector<24x1xf32>
    %86 = vector.broadcast %85 : vector<24x1xf32> to vector<24x256xf32>
    %87 = vector.shape_cast %80 : vector<24x1xf32> to vector<24x1xf32>
    %88 = vector.broadcast %87 : vector<24x1xf32> to vector<24x256xf32>
    %89 = arith.select %84, %86, %88 : vector<24x256xi1>, vector<24x256xf32>
    %90 = arith.mulf %69, %89 : vector<24x256xf32>
    %cst_42 = arith.constant 0.000000e+00 : f32
    %91 = vector.broadcast %cst_42 : f32 to vector<24x128xf32>
    %92 = vector.shape_cast %5 : vector<1x128xi32> to vector<1x128xi32>
    %93 = vector.broadcast %92 : vector<1x128xi32> to vector<24x128xi32>
    %c0_i32 = arith.constant 0 : i32
    %94 = vector.broadcast %c0_i32 : i32 to vector<24x128xi32>
    %95 = arith.cmpi eq, %93, %94 : vector<24x128xi32>
    %96 = vector.shape_cast %76 : vector<24x1xf32> to vector<24x1xf32>
    %97 = vector.broadcast %96 : vector<24x1xf32> to vector<24x128xf32>
    %98 = arith.select %95, %97, %91 : vector<24x128xi1>, vector<24x128xf32>
    %c1_i32 = arith.constant 1 : i32
    %99 = vector.broadcast %c1_i32 : i32 to vector<24x128xi32>
    %100 = arith.cmpi eq, %93, %99 : vector<24x128xi32>
    %101 = vector.shape_cast %80 : vector<24x1xf32> to vector<24x1xf32>
    %102 = vector.broadcast %101 : vector<24x1xf32> to vector<24x128xf32>
    %103 = arith.select %100, %102, %98 : vector<24x128xi1>, vector<24x128xf32>
    %104 = tpu.concatenate %90, %103 in 1 : vector<24x256xf32>, vector<24x128xf32> -> vector<24x384xf32>
    %105 = arith.truncf %104 : vector<24x384xf32> to vector<24x384xbf16>
    %cst_43 = arith.constant dense<0.000000e+00> : vector<8x384xf32>
    %106 = tpu.matmul %2, %105, %cst_43 {dimension_numbers = #tpu.dot_dimension_numbers<[0], [0], [1], [1], [0, 1, 1, 1], [], []>} : vector<24x8xbf16>, vector<24x384xbf16>, vector<8x384xf32> -> vector<8x384xf32>
    %107 = vector.extract_strided_slice %106 {offsets = [0, 256], sizes = [8, 1], strides = [1, 1]} : vector<8x384xf32> to vector<8x1xf32>
    %cst_44 = arith.constant 1.000000e-16 : f32
    %108 = vector.broadcast %cst_44 : f32 to vector<8x1xf32>
    %109 = arith.addf %107, %108 : vector<8x1xf32>
    %110 = tpu.reciprocal %109 {approx = true} : vector<8x1xf32> -> vector<8x1xf32>
    %111 = vector.extract_strided_slice %106 {offsets = [0, 257], sizes = [8, 1], strides = [1, 1]} : vector<8x384xf32> to vector<8x1xf32>
    %cst_45 = arith.constant 1.000000e-16 : f32
    %112 = vector.broadcast %cst_45 : f32 to vector<8x1xf32>
    %113 = arith.addf %111, %112 : vector<8x1xf32>
    %114 = tpu.reciprocal %113 {approx = true} : vector<8x1xf32> -> vector<8x1xf32>
    %115 = vector.extract_strided_slice %106 {offsets = [0, 0], sizes = [8, 256], strides = [1, 1]} : vector<8x384xf32> to vector<8x256xf32>
    %c128_i32_46 = arith.constant 128 : i32
    %116 = vector.broadcast %c128_i32_46 : i32 to vector<1x256xi32>
    %117 = arith.cmpi slt, %4, %116 : vector<1x256xi32>
    %118 = vector.shape_cast %117 : vector<1x256xi1> to vector<1x256xi1>
    %119 = vector.broadcast %118 : vector<1x256xi1> to vector<8x256xi1>
    %120 = vector.shape_cast %110 : vector<8x1xf32> to vector<8x1xf32>
    %121 = vector.broadcast %120 : vector<8x1xf32> to vector<8x256xf32>
    %122 = vector.shape_cast %114 : vector<8x1xf32> to vector<8x1xf32>
    %123 = vector.broadcast %122 : vector<8x1xf32> to vector<8x256xf32>
    %124 = arith.select %119, %121, %123 : vector<8x256xi1>, vector<8x256xf32>
    %125 = arith.mulf %115, %124 : vector<8x256xf32>
    %126 = arith.addf %63, %125 : vector<8x256xf32>
    %127 = vector.extract_strided_slice %126 {offsets = [0, 0], sizes = [8, 128], strides = [1, 1]} : vector<8x256xf32> to vector<8x128xf32>
    %128 = arith.mulf %127, %127 : vector<8x128xf32>
    %cst_47 = arith.constant dense<0.000000e+00> : vector<8xf32>
    %129 = vector.multi_reduction <add>, %128, %cst_47 [1] : vector<8x128xf32> to vector<8xf32>
    %130 = vector.shape_cast %129 : vector<8xf32> to vector<8x1xf32>
    %131 = vector.extract_strided_slice %126 {offsets = [0, 128], sizes = [8, 128], strides = [1, 1]} : vector<8x256xf32> to vector<8x128xf32>
    %132 = arith.mulf %131, %131 : vector<8x128xf32>
    %cst_48 = arith.constant dense<0.000000e+00> : vector<8xf32>
    %133 = vector.multi_reduction <add>, %132, %cst_48 [1] : vector<8x128xf32> to vector<8xf32>
    %134 = vector.shape_cast %133 : vector<8xf32> to vector<8x1xf32>
    %cst_49 = arith.constant 1.000000e-24 : f32
    %135 = vector.broadcast %cst_49 : f32 to vector<8x1xf32>
    %136 = arith.maximumf %130, %135 : vector<8x1xf32>
    %137 = math.rsqrt %136 : vector<8x1xf32>
    %cst_50 = arith.constant 1.000000e-24 : f32
    %138 = vector.broadcast %cst_50 : f32 to vector<8x1xf32>
    %139 = arith.maximumf %134, %138 : vector<8x1xf32>
    %140 = math.rsqrt %139 : vector<8x1xf32>
    %c128_i32_51 = arith.constant 128 : i32
    %141 = vector.broadcast %c128_i32_51 : i32 to vector<1x256xi32>
    %142 = arith.cmpi slt, %4, %141 : vector<1x256xi32>
    %143 = vector.shape_cast %142 : vector<1x256xi1> to vector<1x256xi1>
    %144 = vector.broadcast %143 : vector<1x256xi1> to vector<8x256xi1>
    %145 = vector.shape_cast %137 : vector<8x1xf32> to vector<8x1xf32>
    %146 = vector.broadcast %145 : vector<8x1xf32> to vector<8x256xf32>
    %147 = vector.shape_cast %140 : vector<8x1xf32> to vector<8x1xf32>
    %148 = vector.broadcast %147 : vector<8x1xf32> to vector<8x256xf32>
    %149 = arith.select %144, %146, %148 : vector<8x256xi1>, vector<8x256xf32>
    %150 = arith.mulf %126, %149 : vector<8x256xf32>
    %151 = arith.truncf %150 : vector<8x256xf32> to vector<8x256xbf16>
    %cst_52 = arith.constant dense<0.000000e+00> : vector<24x256xf32>
    %152 = tpu.matmul %0, %151, %cst_52 {dimension_numbers = #tpu.dot_dimension_numbers<[1], [0], [0], [1], [0, 0, 1, 1], [], []>} : vector<24x8xbf16>, vector<8x256xbf16>, vector<24x256xf32> -> vector<24x256xf32>
    %153 = arith.addf %152, %65 : vector<24x256xf32>
    %cst_53 = arith.constant dense<0.000000e+00> : vector<24x256xf32>
    %154 = tpu.matmul %2, %151, %cst_53 {dimension_numbers = #tpu.dot_dimension_numbers<[1], [0], [0], [1], [0, 0, 1, 1], [], []>} : vector<24x8xbf16>, vector<8x256xbf16>, vector<24x256xf32> -> vector<24x256xf32>
    %155 = arith.addf %154, %66 : vector<24x256xf32>
    %156 = arith.mulf %155, %153 : vector<24x256xf32>
    %157 = vector.extract_strided_slice %156 {offsets = [0, 0], sizes = [24, 128], strides = [1, 1]} : vector<24x256xf32> to vector<24x128xf32>
    %cst_54 = arith.constant dense<0.000000e+00> : vector<24xf32>
    %158 = vector.multi_reduction <add>, %157, %cst_54 [1] : vector<24x128xf32> to vector<24xf32>
    %159 = vector.shape_cast %158 : vector<24xf32> to vector<24x1xf32>
    %160 = math.exp %159 : vector<24x1xf32>
    %161 = vector.extract_strided_slice %156 {offsets = [0, 128], sizes = [24, 128], strides = [1, 1]} : vector<24x256xf32> to vector<24x128xf32>
    %cst_55 = arith.constant dense<0.000000e+00> : vector<24xf32>
    %162 = vector.multi_reduction <add>, %161, %cst_55 [1] : vector<24x128xf32> to vector<24xf32>
    %163 = vector.shape_cast %162 : vector<24xf32> to vector<24x1xf32>
    %164 = math.exp %163 : vector<24x1xf32>
    %c128_i32_56 = arith.constant 128 : i32
    %165 = vector.broadcast %c128_i32_56 : i32 to vector<1x256xi32>
    %166 = arith.cmpi slt, %4, %165 : vector<1x256xi32>
    %167 = vector.shape_cast %166 : vector<1x256xi1> to vector<1x256xi1>
    %168 = vector.broadcast %167 : vector<1x256xi1> to vector<24x256xi1>
    %169 = vector.shape_cast %160 : vector<24x1xf32> to vector<24x1xf32>
    %170 = vector.broadcast %169 : vector<24x1xf32> to vector<24x256xf32>
    %171 = vector.shape_cast %164 : vector<24x1xf32> to vector<24x1xf32>
    %172 = vector.broadcast %171 : vector<24x1xf32> to vector<24x256xf32>
    %173 = arith.select %168, %170, %172 : vector<24x256xi1>, vector<24x256xf32>
    %174 = arith.mulf %153, %173 : vector<24x256xf32>
    %cst_57 = arith.constant 0.000000e+00 : f32
    %175 = vector.broadcast %cst_57 : f32 to vector<24x128xf32>
    %176 = vector.shape_cast %5 : vector<1x128xi32> to vector<1x128xi32>
    %177 = vector.broadcast %176 : vector<1x128xi32> to vector<24x128xi32>
    %c0_i32_58 = arith.constant 0 : i32
    %178 = vector.broadcast %c0_i32_58 : i32 to vector<24x128xi32>
    %179 = arith.cmpi eq, %177, %178 : vector<24x128xi32>
    %180 = vector.shape_cast %160 : vector<24x1xf32> to vector<24x1xf32>
    %181 = vector.broadcast %180 : vector<24x1xf32> to vector<24x128xf32>
    %182 = arith.select %179, %181, %175 : vector<24x128xi1>, vector<24x128xf32>
    %c1_i32_59 = arith.constant 1 : i32
    %183 = vector.broadcast %c1_i32_59 : i32 to vector<24x128xi32>
    %184 = arith.cmpi eq, %177, %183 : vector<24x128xi32>
    %185 = vector.shape_cast %164 : vector<24x1xf32> to vector<24x1xf32>
    %186 = vector.broadcast %185 : vector<24x1xf32> to vector<24x128xf32>
    %187 = arith.select %184, %186, %182 : vector<24x128xi1>, vector<24x128xf32>
    %188 = tpu.concatenate %174, %187 in 1 : vector<24x256xf32>, vector<24x128xf32> -> vector<24x384xf32>
    %189 = arith.truncf %188 : vector<24x384xf32> to vector<24x384xbf16>
    %cst_60 = arith.constant dense<0.000000e+00> : vector<8x384xf32>
    %190 = tpu.matmul %2, %189, %cst_60 {dimension_numbers = #tpu.dot_dimension_numbers<[0], [0], [1], [1], [0, 1, 1, 1], [], []>} : vector<24x8xbf16>, vector<24x384xbf16>, vector<8x384xf32> -> vector<8x384xf32>
    %191 = vector.extract_strided_slice %190 {offsets = [0, 256], sizes = [8, 1], strides = [1, 1]} : vector<8x384xf32> to vector<8x1xf32>
    %cst_61 = arith.constant 1.000000e-16 : f32
    %192 = vector.broadcast %cst_61 : f32 to vector<8x1xf32>
    %193 = arith.addf %191, %192 : vector<8x1xf32>
    %194 = tpu.reciprocal %193 {approx = true} : vector<8x1xf32> -> vector<8x1xf32>
    %195 = vector.extract_strided_slice %190 {offsets = [0, 257], sizes = [8, 1], strides = [1, 1]} : vector<8x384xf32> to vector<8x1xf32>
    %cst_62 = arith.constant 1.000000e-16 : f32
    %196 = vector.broadcast %cst_62 : f32 to vector<8x1xf32>
    %197 = arith.addf %195, %196 : vector<8x1xf32>
    %198 = tpu.reciprocal %197 {approx = true} : vector<8x1xf32> -> vector<8x1xf32>
    %199 = vector.extract_strided_slice %190 {offsets = [0, 0], sizes = [8, 256], strides = [1, 1]} : vector<8x384xf32> to vector<8x256xf32>
    %c128_i32_63 = arith.constant 128 : i32
    %200 = vector.broadcast %c128_i32_63 : i32 to vector<1x256xi32>
    %201 = arith.cmpi slt, %4, %200 : vector<1x256xi32>
    %202 = vector.shape_cast %201 : vector<1x256xi1> to vector<1x256xi1>
    %203 = vector.broadcast %202 : vector<1x256xi1> to vector<8x256xi1>
    %204 = vector.shape_cast %194 : vector<8x1xf32> to vector<8x1xf32>
    %205 = vector.broadcast %204 : vector<8x1xf32> to vector<8x256xf32>
    %206 = vector.shape_cast %198 : vector<8x1xf32> to vector<8x1xf32>
    %207 = vector.broadcast %206 : vector<8x1xf32> to vector<8x256xf32>
    %208 = arith.select %203, %205, %207 : vector<8x256xi1>, vector<8x256xf32>
    %209 = arith.mulf %199, %208 : vector<8x256xf32>
    %210 = arith.addf %150, %209 : vector<8x256xf32>
    %211 = vector.extract_strided_slice %210 {offsets = [0, 0], sizes = [8, 128], strides = [1, 1]} : vector<8x256xf32> to vector<8x128xf32>
    %212 = arith.mulf %211, %211 : vector<8x128xf32>
    %cst_64 = arith.constant dense<0.000000e+00> : vector<8xf32>
    %213 = vector.multi_reduction <add>, %212, %cst_64 [1] : vector<8x128xf32> to vector<8xf32>
    %214 = vector.shape_cast %213 : vector<8xf32> to vector<8x1xf32>
    %215 = vector.extract_strided_slice %210 {offsets = [0, 128], sizes = [8, 128], strides = [1, 1]} : vector<8x256xf32> to vector<8x128xf32>
    %216 = arith.mulf %215, %215 : vector<8x128xf32>
    %cst_65 = arith.constant dense<0.000000e+00> : vector<8xf32>
    %217 = vector.multi_reduction <add>, %216, %cst_65 [1] : vector<8x128xf32> to vector<8xf32>
    %218 = vector.shape_cast %217 : vector<8xf32> to vector<8x1xf32>
    %cst_66 = arith.constant 1.000000e-24 : f32
    %219 = vector.broadcast %cst_66 : f32 to vector<8x1xf32>
    %220 = arith.maximumf %214, %219 : vector<8x1xf32>
    %221 = math.rsqrt %220 : vector<8x1xf32>
    %cst_67 = arith.constant 1.000000e-24 : f32
    %222 = vector.broadcast %cst_67 : f32 to vector<8x1xf32>
    %223 = arith.maximumf %218, %222 : vector<8x1xf32>
    %224 = math.rsqrt %223 : vector<8x1xf32>
    %c128_i32_68 = arith.constant 128 : i32
    %225 = vector.broadcast %c128_i32_68 : i32 to vector<1x256xi32>
    %226 = arith.cmpi slt, %4, %225 : vector<1x256xi32>
    %227 = vector.shape_cast %226 : vector<1x256xi1> to vector<1x256xi1>
    %228 = vector.broadcast %227 : vector<1x256xi1> to vector<8x256xi1>
    %229 = vector.shape_cast %221 : vector<8x1xf32> to vector<8x1xf32>
    %230 = vector.broadcast %229 : vector<8x1xf32> to vector<8x256xf32>
    %231 = vector.shape_cast %224 : vector<8x1xf32> to vector<8x1xf32>
    %232 = vector.broadcast %231 : vector<8x1xf32> to vector<8x256xf32>
    %233 = arith.select %228, %230, %232 : vector<8x256xi1>, vector<8x256xf32>
    %234 = arith.mulf %210, %233 : vector<8x256xf32>
    %235 = arith.truncf %234 : vector<8x256xf32> to vector<8x256xbf16>
    %cst_69 = arith.constant dense<0.000000e+00> : vector<24x256xf32>
    %236 = tpu.matmul %0, %235, %cst_69 {dimension_numbers = #tpu.dot_dimension_numbers<[1], [0], [0], [1], [0, 0, 1, 1], [], []>} : vector<24x8xbf16>, vector<8x256xbf16>, vector<24x256xf32> -> vector<24x256xf32>
    %237 = arith.addf %236, %65 : vector<24x256xf32>
    %cst_70 = arith.constant dense<0.000000e+00> : vector<24x256xf32>
    %238 = tpu.matmul %2, %235, %cst_70 {dimension_numbers = #tpu.dot_dimension_numbers<[1], [0], [0], [1], [0, 0, 1, 1], [], []>} : vector<24x8xbf16>, vector<8x256xbf16>, vector<24x256xf32> -> vector<24x256xf32>
    %239 = arith.addf %238, %66 : vector<24x256xf32>
    %240 = arith.mulf %239, %237 : vector<24x256xf32>
    %241 = vector.extract_strided_slice %240 {offsets = [0, 0], sizes = [24, 128], strides = [1, 1]} : vector<24x256xf32> to vector<24x128xf32>
    %cst_71 = arith.constant dense<0.000000e+00> : vector<24xf32>
    %242 = vector.multi_reduction <add>, %241, %cst_71 [1] : vector<24x128xf32> to vector<24xf32>
    %243 = vector.shape_cast %242 : vector<24xf32> to vector<24x1xf32>
    %244 = math.exp %243 : vector<24x1xf32>
    %245 = vector.extract_strided_slice %240 {offsets = [0, 128], sizes = [24, 128], strides = [1, 1]} : vector<24x256xf32> to vector<24x128xf32>
    %cst_72 = arith.constant dense<0.000000e+00> : vector<24xf32>
    %246 = vector.multi_reduction <add>, %245, %cst_72 [1] : vector<24x128xf32> to vector<24xf32>
    %247 = vector.shape_cast %246 : vector<24xf32> to vector<24x1xf32>
    %248 = math.exp %247 : vector<24x1xf32>
    %c128_i32_73 = arith.constant 128 : i32
    %249 = vector.broadcast %c128_i32_73 : i32 to vector<1x256xi32>
    %250 = arith.cmpi slt, %4, %249 : vector<1x256xi32>
    %251 = vector.shape_cast %250 : vector<1x256xi1> to vector<1x256xi1>
    %252 = vector.broadcast %251 : vector<1x256xi1> to vector<24x256xi1>
    %253 = vector.shape_cast %244 : vector<24x1xf32> to vector<24x1xf32>
    %254 = vector.broadcast %253 : vector<24x1xf32> to vector<24x256xf32>
    %255 = vector.shape_cast %248 : vector<24x1xf32> to vector<24x1xf32>
    %256 = vector.broadcast %255 : vector<24x1xf32> to vector<24x256xf32>
    %257 = arith.select %252, %254, %256 : vector<24x256xi1>, vector<24x256xf32>
    %258 = arith.mulf %237, %257 : vector<24x256xf32>
    %cst_74 = arith.constant 0.000000e+00 : f32
    %259 = vector.broadcast %cst_74 : f32 to vector<24x128xf32>
    %260 = vector.shape_cast %5 : vector<1x128xi32> to vector<1x128xi32>
    %261 = vector.broadcast %260 : vector<1x128xi32> to vector<24x128xi32>
    %c0_i32_75 = arith.constant 0 : i32
    %262 = vector.broadcast %c0_i32_75 : i32 to vector<24x128xi32>
    %263 = arith.cmpi eq, %261, %262 : vector<24x128xi32>
    %264 = vector.shape_cast %244 : vector<24x1xf32> to vector<24x1xf32>
    %265 = vector.broadcast %264 : vector<24x1xf32> to vector<24x128xf32>
    %266 = arith.select %263, %265, %259 : vector<24x128xi1>, vector<24x128xf32>
    %c1_i32_76 = arith.constant 1 : i32
    %267 = vector.broadcast %c1_i32_76 : i32 to vector<24x128xi32>
    %268 = arith.cmpi eq, %261, %267 : vector<24x128xi32>
    %269 = vector.shape_cast %248 : vector<24x1xf32> to vector<24x1xf32>
    %270 = vector.broadcast %269 : vector<24x1xf32> to vector<24x128xf32>
    %271 = arith.select %268, %270, %266 : vector<24x128xi1>, vector<24x128xf32>
    %272 = tpu.concatenate %258, %271 in 1 : vector<24x256xf32>, vector<24x128xf32> -> vector<24x384xf32>
    %273 = arith.truncf %272 : vector<24x384xf32> to vector<24x384xbf16>
    %c128_i32_77 = arith.constant 128 : i32
    %274 = vector.broadcast %c128_i32_77 : i32 to vector<1x256xi32>
    %275 = arith.cmpi slt, %4, %274 : vector<1x256xi32>
    %276 = vector.shape_cast %275 : vector<1x256xi1> to vector<1x256xi1>
    %277 = vector.broadcast %276 : vector<1x256xi1> to vector<24x256xi1>
    %278 = vector.shape_cast %244 : vector<24x1xf32> to vector<24x1xf32>
    %279 = vector.broadcast %278 : vector<24x1xf32> to vector<24x256xf32>
    %280 = vector.shape_cast %248 : vector<24x1xf32> to vector<24x1xf32>
    %281 = vector.broadcast %280 : vector<24x1xf32> to vector<24x256xf32>
    %282 = arith.select %277, %279, %281 : vector<24x256xi1>, vector<24x256xf32>
    %283 = arith.mulf %239, %282 : vector<24x256xf32>
    %cst_78 = arith.constant 0.000000e+00 : f32
    %284 = vector.broadcast %cst_78 : f32 to vector<24x128xf32>
    %285 = vector.shape_cast %5 : vector<1x128xi32> to vector<1x128xi32>
    %286 = vector.broadcast %285 : vector<1x128xi32> to vector<24x128xi32>
    %c0_i32_79 = arith.constant 0 : i32
    %287 = vector.broadcast %c0_i32_79 : i32 to vector<24x128xi32>
    %288 = arith.cmpi eq, %286, %287 : vector<24x128xi32>
    %289 = vector.shape_cast %244 : vector<24x1xf32> to vector<24x1xf32>
    %290 = vector.broadcast %289 : vector<24x1xf32> to vector<24x128xf32>
    %291 = arith.select %288, %290, %284 : vector<24x128xi1>, vector<24x128xf32>
    %c1_i32_80 = arith.constant 1 : i32
    %292 = vector.broadcast %c1_i32_80 : i32 to vector<24x128xi32>
    %293 = arith.cmpi eq, %286, %292 : vector<24x128xi32>
    %294 = vector.shape_cast %248 : vector<24x1xf32> to vector<24x1xf32>
    %295 = vector.broadcast %294 : vector<24x1xf32> to vector<24x128xf32>
    %296 = arith.select %293, %295, %291 : vector<24x128xi1>, vector<24x128xf32>
    %297 = tpu.concatenate %283, %296 in 1 : vector<24x256xf32>, vector<24x128xf32> -> vector<24x384xf32>
    %298 = arith.truncf %297 : vector<24x384xf32> to vector<24x384xbf16>
    %cst_81 = arith.constant dense<0.000000e+00> : vector<8x384xf32>
    %299 = tpu.matmul %2, %273, %cst_81 {dimension_numbers = #tpu.dot_dimension_numbers<[0], [0], [1], [1], [0, 1, 1, 1], [], []>} : vector<24x8xbf16>, vector<24x384xbf16>, vector<8x384xf32> -> vector<8x384xf32>
    %cst_82 = arith.constant dense<0.000000e+00> : vector<8x384xf32>
    %300 = tpu.matmul %0, %298, %cst_82 {dimension_numbers = #tpu.dot_dimension_numbers<[0], [0], [1], [1], [0, 1, 1, 1], [], []>} : vector<24x8xbf16>, vector<24x384xbf16>, vector<8x384xf32> -> vector<8x384xf32>
    %301 = arith.addf %299, %300 : vector<8x384xf32>
    %302 = vector.extract_strided_slice %301 {offsets = [0, 256], sizes = [8, 1], strides = [1, 1]} : vector<8x384xf32> to vector<8x1xf32>
    %cst_83 = arith.constant 1.000000e-16 : f32
    %303 = vector.broadcast %cst_83 : f32 to vector<8x1xf32>
    %304 = arith.addf %302, %303 : vector<8x1xf32>
    %305 = tpu.reciprocal %304 {approx = true} : vector<8x1xf32> -> vector<8x1xf32>
    %306 = vector.extract_strided_slice %301 {offsets = [0, 257], sizes = [8, 1], strides = [1, 1]} : vector<8x384xf32> to vector<8x1xf32>
    %cst_84 = arith.constant 1.000000e-16 : f32
    %307 = vector.broadcast %cst_84 : f32 to vector<8x1xf32>
    %308 = arith.addf %306, %307 : vector<8x1xf32>
    %309 = tpu.reciprocal %308 {approx = true} : vector<8x1xf32> -> vector<8x1xf32>
    %310 = vector.extract_strided_slice %301 {offsets = [0, 0], sizes = [8, 256], strides = [1, 1]} : vector<8x384xf32> to vector<8x256xf32>
    %c128_i32_85 = arith.constant 128 : i32
    %311 = vector.broadcast %c128_i32_85 : i32 to vector<1x256xi32>
    %312 = arith.cmpi slt, %4, %311 : vector<1x256xi32>
    %313 = vector.shape_cast %312 : vector<1x256xi1> to vector<1x256xi1>
    %314 = vector.broadcast %313 : vector<1x256xi1> to vector<8x256xi1>
    %315 = vector.shape_cast %305 : vector<8x1xf32> to vector<8x1xf32>
    %316 = vector.broadcast %315 : vector<8x1xf32> to vector<8x256xf32>
    %317 = vector.shape_cast %309 : vector<8x1xf32> to vector<8x1xf32>
    %318 = vector.broadcast %317 : vector<8x1xf32> to vector<8x256xf32>
    %319 = arith.select %314, %316, %318 : vector<8x256xi1>, vector<8x256xf32>
    %320 = arith.mulf %310, %319 : vector<8x256xf32>
    %cst_86 = arith.constant dense<0.000000e+00> : vector<8x384xf32>
    %321 = tpu.matmul %3, %273, %cst_86 {dimension_numbers = #tpu.dot_dimension_numbers<[0], [0], [1], [1], [0, 1, 1, 1], [], []>} : vector<24x8xbf16>, vector<24x384xbf16>, vector<8x384xf32> -> vector<8x384xf32>
    %cst_87 = arith.constant dense<0.000000e+00> : vector<8x384xf32>
    %322 = tpu.matmul %1, %298, %cst_87 {dimension_numbers = #tpu.dot_dimension_numbers<[0], [0], [1], [1], [0, 1, 1, 1], [], []>} : vector<24x8xbf16>, vector<24x384xbf16>, vector<8x384xf32> -> vector<8x384xf32>
    %323 = arith.addf %321, %322 : vector<8x384xf32>
    %324 = vector.extract_strided_slice %323 {offsets = [0, 256], sizes = [8, 1], strides = [1, 1]} : vector<8x384xf32> to vector<8x1xf32>
    %cst_88 = arith.constant 1.000000e-16 : f32
    %325 = vector.broadcast %cst_88 : f32 to vector<8x1xf32>
    %326 = arith.addf %324, %325 : vector<8x1xf32>
    %327 = tpu.reciprocal %326 {approx = true} : vector<8x1xf32> -> vector<8x1xf32>
    %328 = vector.extract_strided_slice %323 {offsets = [0, 257], sizes = [8, 1], strides = [1, 1]} : vector<8x384xf32> to vector<8x1xf32>
    %cst_89 = arith.constant 1.000000e-16 : f32
    %329 = vector.broadcast %cst_89 : f32 to vector<8x1xf32>
    %330 = arith.addf %328, %329 : vector<8x1xf32>
    %331 = tpu.reciprocal %330 {approx = true} : vector<8x1xf32> -> vector<8x1xf32>
    %332 = vector.extract_strided_slice %323 {offsets = [0, 0], sizes = [8, 256], strides = [1, 1]} : vector<8x384xf32> to vector<8x256xf32>
    %c128_i32_90 = arith.constant 128 : i32
    %333 = vector.broadcast %c128_i32_90 : i32 to vector<1x256xi32>
    %334 = arith.cmpi slt, %4, %333 : vector<1x256xi32>
    %335 = vector.shape_cast %334 : vector<1x256xi1> to vector<1x256xi1>
    %336 = vector.broadcast %335 : vector<1x256xi1> to vector<8x256xi1>
    %337 = vector.shape_cast %327 : vector<8x1xf32> to vector<8x1xf32>
    %338 = vector.broadcast %337 : vector<8x1xf32> to vector<8x256xf32>
    %339 = vector.shape_cast %331 : vector<8x1xf32> to vector<8x1xf32>
    %340 = vector.broadcast %339 : vector<8x1xf32> to vector<8x256xf32>
    %341 = arith.select %336, %338, %340 : vector<8x256xi1>, vector<8x256xf32>
    %342 = arith.mulf %332, %341 : vector<8x256xf32>
    %cst_91 = arith.constant 0.000000e+00 : f32
    %343 = vector.broadcast %cst_91 : f32 to vector<8x256xf32>
    %344 = arith.cmpf oge, %320, %343 : vector<8x256xf32>
    %cst_92 = arith.constant 0.00999999977 : f32
    %345 = vector.broadcast %cst_92 : f32 to vector<8x256xf32>
    %346 = arith.mulf %345, %320 : vector<8x256xf32>
    %347 = arith.select %344, %320, %346 : vector<8x256xi1>, vector<8x256xf32>
    %348 = arith.addf %234, %347 : vector<8x256xf32>
    %cst_93 = arith.constant 0.000000e+00 : f32
    %349 = vector.broadcast %cst_93 : f32 to vector<8x256xf32>
    %350 = arith.cmpf oge, %342, %349 : vector<8x256xf32>
    %cst_94 = arith.constant 0.00999999977 : f32
    %351 = vector.broadcast %cst_94 : f32 to vector<8x256xf32>
    %352 = arith.mulf %351, %342 : vector<8x256xf32>
    %353 = arith.select %350, %342, %352 : vector<8x256xi1>, vector<8x256xf32>
    %354 = arith.addf %44, %353 : vector<8x256xf32>
    %c0_95 = arith.constant 0 : index
    %c0_96 = arith.constant 0 : index
    %355 = vector.load %arg8[%c0_95, %c0_96] : memref<16x128xf32, #tpu.memory_space<vmem>>, vector<16x128xf32>
    %356 = arith.mulf %355, %355 : vector<16x128xf32>
    %cst_97 = arith.constant dense<0.000000e+00> : vector<16xf32>
    %357 = vector.multi_reduction <add>, %356, %cst_97 [1] : vector<16x128xf32> to vector<16xf32>
    %358 = vector.shape_cast %357 : vector<16xf32> to vector<16x1xf32>
    %cst_98 = arith.constant 1.000000e-24 : f32
    %359 = vector.broadcast %cst_98 : f32 to vector<16x1xf32>
    %360 = arith.maximumf %358, %359 : vector<16x1xf32>
    %361 = math.rsqrt %360 : vector<16x1xf32>
    %362 = vector.broadcast %361 : vector<16x1xf32> to vector<16x128xf32>
    %363 = arith.mulf %355, %362 : vector<16x128xf32>
    %c0_99 = arith.constant 0 : index
    %c0_100 = arith.constant 0 : index
    %364 = vector.load %arg9[%c0_99, %c0_100] : memref<16x2xf32, #tpu.memory_space<vmem>>, vector<16x2xf32>
    %365 = vector.extract_strided_slice %363 {offsets = [0, 0], sizes = [8, 128], strides = [1, 1]} : vector<16x128xf32> to vector<8x128xf32>
    %366 = vector.extract_strided_slice %364 {offsets = [0, 0], sizes = [8, 2], strides = [1, 1]} : vector<16x2xf32> to vector<8x2xf32>
    %367 = vector.extract_strided_slice %366 {offsets = [0, 0], sizes = [8, 1], strides = [1, 1]} : vector<8x2xf32> to vector<8x1xf32>
    %368 = vector.extract_strided_slice %366 {offsets = [0, 1], sizes = [8, 1], strides = [1, 1]} : vector<8x2xf32> to vector<8x1xf32>
    %cst_101 = arith.constant 0.000000e+00 : f32
    %369 = vector.broadcast %cst_101 : f32 to vector<8x128xf32>
    %370 = vector.shape_cast %5 : vector<1x128xi32> to vector<1x128xi32>
    %371 = vector.broadcast %370 : vector<1x128xi32> to vector<8x128xi32>
    %c0_i32_102 = arith.constant 0 : i32
    %372 = vector.broadcast %c0_i32_102 : i32 to vector<8x128xi32>
    %373 = arith.cmpi eq, %371, %372 : vector<8x128xi32>
    %374 = vector.shape_cast %367 : vector<8x1xf32> to vector<8x1xf32>
    %375 = vector.broadcast %374 : vector<8x1xf32> to vector<8x128xf32>
    %376 = arith.select %373, %375, %369 : vector<8x128xi1>, vector<8x128xf32>
    %c1_i32_103 = arith.constant 1 : i32
    %377 = vector.broadcast %c1_i32_103 : i32 to vector<8x128xi32>
    %378 = arith.cmpi eq, %371, %377 : vector<8x128xi32>
    %379 = vector.shape_cast %368 : vector<8x1xf32> to vector<8x1xf32>
    %380 = vector.broadcast %379 : vector<8x1xf32> to vector<8x128xf32>
    %381 = arith.select %378, %380, %376 : vector<8x128xi1>, vector<8x128xf32>
    %c2_i32 = arith.constant 2 : i32
    %382 = vector.broadcast %c2_i32 : i32 to vector<8x128xi32>
    %383 = arith.cmpi eq, %371, %382 : vector<8x128xi32>
    %384 = vector.shape_cast %305 : vector<8x1xf32> to vector<8x1xf32>
    %385 = vector.broadcast %384 : vector<8x1xf32> to vector<8x128xf32>
    %386 = arith.select %383, %385, %381 : vector<8x128xi1>, vector<8x128xf32>
    %c3_i32 = arith.constant 3 : i32
    %387 = vector.broadcast %c3_i32 : i32 to vector<8x128xi32>
    %388 = arith.cmpi eq, %371, %387 : vector<8x128xi32>
    %389 = vector.shape_cast %309 : vector<8x1xf32> to vector<8x1xf32>
    %390 = vector.broadcast %389 : vector<8x1xf32> to vector<8x128xf32>
    %391 = arith.select %388, %390, %386 : vector<8x128xi1>, vector<8x128xf32>
    %392 = tpu.concatenate %365, %391 in 1 : vector<8x128xf32>, vector<8x128xf32> -> vector<8x256xf32>
    %393 = arith.truncf %392 : vector<8x256xf32> to vector<8x256xbf16>
    %394 = vector.extract_strided_slice %363 {offsets = [8, 0], sizes = [8, 128], strides = [1, 1]} : vector<16x128xf32> to vector<8x128xf32>
    %395 = vector.extract_strided_slice %364 {offsets = [8, 0], sizes = [8, 2], strides = [1, 1]} : vector<16x2xf32> to vector<8x2xf32>
    %396 = vector.extract_strided_slice %395 {offsets = [0, 0], sizes = [8, 1], strides = [1, 1]} : vector<8x2xf32> to vector<8x1xf32>
    %397 = vector.extract_strided_slice %395 {offsets = [0, 1], sizes = [8, 1], strides = [1, 1]} : vector<8x2xf32> to vector<8x1xf32>
    %cst_104 = arith.constant 0.000000e+00 : f32
    %398 = vector.broadcast %cst_104 : f32 to vector<8x128xf32>
    %399 = vector.shape_cast %5 : vector<1x128xi32> to vector<1x128xi32>
    %400 = vector.broadcast %399 : vector<1x128xi32> to vector<8x128xi32>
    %c0_i32_105 = arith.constant 0 : i32
    %401 = vector.broadcast %c0_i32_105 : i32 to vector<8x128xi32>
    %402 = arith.cmpi eq, %400, %401 : vector<8x128xi32>
    %403 = vector.shape_cast %396 : vector<8x1xf32> to vector<8x1xf32>
    %404 = vector.broadcast %403 : vector<8x1xf32> to vector<8x128xf32>
    %405 = arith.select %402, %404, %398 : vector<8x128xi1>, vector<8x128xf32>
    %c1_i32_106 = arith.constant 1 : i32
    %406 = vector.broadcast %c1_i32_106 : i32 to vector<8x128xi32>
    %407 = arith.cmpi eq, %400, %406 : vector<8x128xi32>
    %408 = vector.shape_cast %397 : vector<8x1xf32> to vector<8x1xf32>
    %409 = vector.broadcast %408 : vector<8x1xf32> to vector<8x128xf32>
    %410 = arith.select %407, %409, %405 : vector<8x128xi1>, vector<8x128xf32>
    %c2_i32_107 = arith.constant 2 : i32
    %411 = vector.broadcast %c2_i32_107 : i32 to vector<8x128xi32>
    %412 = arith.cmpi eq, %400, %411 : vector<8x128xi32>
    %413 = vector.shape_cast %327 : vector<8x1xf32> to vector<8x1xf32>
    %414 = vector.broadcast %413 : vector<8x1xf32> to vector<8x128xf32>
    %415 = arith.select %412, %414, %410 : vector<8x128xi1>, vector<8x128xf32>
    %c3_i32_108 = arith.constant 3 : i32
    %416 = vector.broadcast %c3_i32_108 : i32 to vector<8x128xi32>
    %417 = arith.cmpi eq, %400, %416 : vector<8x128xi32>
    %418 = vector.shape_cast %331 : vector<8x1xf32> to vector<8x1xf32>
    %419 = vector.broadcast %418 : vector<8x1xf32> to vector<8x128xf32>
    %420 = arith.select %417, %419, %415 : vector<8x128xi1>, vector<8x128xf32>
    %421 = tpu.concatenate %394, %420 in 1 : vector<8x128xf32>, vector<8x128xf32> -> vector<8x256xf32>
    %422 = arith.truncf %421 : vector<8x256xf32> to vector<8x256xbf16>
    %cst_109 = arith.constant dense<0.000000e+00> : vector<24x256xf32>
    %423 = tpu.matmul %0, %393, %cst_109 {dimension_numbers = #tpu.dot_dimension_numbers<[1], [0], [0], [1], [0, 0, 1, 1], [], []>} : vector<24x8xbf16>, vector<8x256xbf16>, vector<24x256xf32> -> vector<24x256xf32>
    %cst_110 = arith.constant dense<0.000000e+00> : vector<24x256xf32>
    %424 = tpu.matmul %1, %422, %cst_110 {dimension_numbers = #tpu.dot_dimension_numbers<[1], [0], [0], [1], [0, 0, 1, 1], [], []>} : vector<24x8xbf16>, vector<8x256xbf16>, vector<24x256xf32> -> vector<24x256xf32>
    %425 = arith.addf %423, %424 : vector<24x256xf32>
    %cst_111 = arith.constant dense<0.000000e+00> : vector<24x256xf32>
    %426 = tpu.matmul %2, %393, %cst_111 {dimension_numbers = #tpu.dot_dimension_numbers<[1], [0], [0], [1], [0, 0, 1, 1], [], []>} : vector<24x8xbf16>, vector<8x256xbf16>, vector<24x256xf32> -> vector<24x256xf32>
    %cst_112 = arith.constant dense<0.000000e+00> : vector<24x256xf32>
    %427 = tpu.matmul %3, %422, %cst_112 {dimension_numbers = #tpu.dot_dimension_numbers<[1], [0], [0], [1], [0, 0, 1, 1], [], []>} : vector<24x8xbf16>, vector<8x256xbf16>, vector<24x256xf32> -> vector<24x256xf32>
    %428 = arith.addf %426, %427 : vector<24x256xf32>
    %429 = vector.extract_strided_slice %428 {offsets = [0, 130], sizes = [24, 1], strides = [1, 1]} : vector<24x256xf32> to vector<24x1xf32>
    %430 = arith.mulf %244, %429 : vector<24x1xf32>
    %431 = vector.extract_strided_slice %425 {offsets = [0, 128], sizes = [24, 1], strides = [1, 1]} : vector<24x256xf32> to vector<24x1xf32>
    %432 = arith.mulf %430, %431 : vector<24x1xf32>
    %433 = vector.extract_strided_slice %428 {offsets = [0, 131], sizes = [24, 1], strides = [1, 1]} : vector<24x256xf32> to vector<24x1xf32>
    %434 = arith.mulf %248, %433 : vector<24x1xf32>
    %435 = vector.extract_strided_slice %425 {offsets = [0, 129], sizes = [24, 1], strides = [1, 1]} : vector<24x256xf32> to vector<24x1xf32>
    %436 = arith.mulf %434, %435 : vector<24x1xf32>
    %437 = arith.maximumf %432, %436 : vector<24x1xf32>
    %cst_113 = arith.constant 0.000000e+00 : f32
    %438 = vector.broadcast %cst_113 : f32 to vector<24x1xf32>
    %439 = arith.maximumf %437, %438 : vector<24x1xf32>
    %440 = vector.extract_strided_slice %425 {offsets = [0, 130], sizes = [24, 1], strides = [1, 1]} : vector<24x256xf32> to vector<24x1xf32>
    %441 = arith.mulf %244, %440 : vector<24x1xf32>
    %442 = vector.extract_strided_slice %428 {offsets = [0, 128], sizes = [24, 1], strides = [1, 1]} : vector<24x256xf32> to vector<24x1xf32>
    %443 = arith.mulf %441, %442 : vector<24x1xf32>
    %444 = vector.extract_strided_slice %425 {offsets = [0, 131], sizes = [24, 1], strides = [1, 1]} : vector<24x256xf32> to vector<24x1xf32>
    %445 = arith.mulf %248, %444 : vector<24x1xf32>
    %446 = vector.extract_strided_slice %428 {offsets = [0, 129], sizes = [24, 1], strides = [1, 1]} : vector<24x256xf32> to vector<24x1xf32>
    %447 = arith.mulf %445, %446 : vector<24x1xf32>
    %448 = arith.maximumf %443, %447 : vector<24x1xf32>
    %cst_114 = arith.constant 0.000000e+00 : f32
    %449 = vector.broadcast %cst_114 : f32 to vector<24x1xf32>
    %450 = arith.maximumf %448, %449 : vector<24x1xf32>
    %451 = vector.extract_strided_slice %425 {offsets = [0, 0], sizes = [24, 128], strides = [1, 1]} : vector<24x256xf32> to vector<24x128xf32>
    %452 = vector.extract_strided_slice %428 {offsets = [0, 0], sizes = [24, 128], strides = [1, 1]} : vector<24x256xf32> to vector<24x128xf32>
    %453 = vector.broadcast %439 : vector<24x1xf32> to vector<24x128xf32>
    %454 = arith.mulf %451, %453 : vector<24x128xf32>
    %455 = arith.truncf %454 : vector<24x128xf32> to vector<24x128xbf16>
    %456 = vector.broadcast %450 : vector<24x1xf32> to vector<24x128xf32>
    %457 = arith.mulf %452, %456 : vector<24x128xf32>
    %458 = arith.truncf %457 : vector<24x128xf32> to vector<24x128xbf16>
    %cst_115 = arith.constant dense<0.000000e+00> : vector<8x128xf32>
    %459 = tpu.matmul %2, %455, %cst_115 {dimension_numbers = #tpu.dot_dimension_numbers<[0], [0], [1], [1], [0, 1, 1, 1], [], []>} : vector<24x8xbf16>, vector<24x128xbf16>, vector<8x128xf32> -> vector<8x128xf32>
    %cst_116 = arith.constant dense<0.000000e+00> : vector<8x128xf32>
    %460 = tpu.matmul %0, %458, %cst_116 {dimension_numbers = #tpu.dot_dimension_numbers<[0], [0], [1], [1], [0, 1, 1, 1], [], []>} : vector<24x8xbf16>, vector<24x128xbf16>, vector<8x128xf32> -> vector<8x128xf32>
    %461 = arith.addf %459, %460 : vector<8x128xf32>
    %cst_117 = arith.constant dense<0.000000e+00> : vector<8x128xf32>
    %462 = tpu.matmul %3, %455, %cst_117 {dimension_numbers = #tpu.dot_dimension_numbers<[0], [0], [1], [1], [0, 1, 1, 1], [], []>} : vector<24x8xbf16>, vector<24x128xbf16>, vector<8x128xf32> -> vector<8x128xf32>
    %cst_118 = arith.constant dense<0.000000e+00> : vector<8x128xf32>
    %463 = tpu.matmul %1, %458, %cst_118 {dimension_numbers = #tpu.dot_dimension_numbers<[0], [0], [1], [1], [0, 1, 1, 1], [], []>} : vector<24x8xbf16>, vector<24x128xbf16>, vector<8x128xf32> -> vector<8x128xf32>
    %464 = arith.addf %462, %463 : vector<8x128xf32>
    %cst_119 = arith.constant 0.000000e+00 : f32
    %465 = vector.broadcast %cst_119 : f32 to vector<8x128xf32>
    %466 = arith.cmpf oge, %461, %465 : vector<8x128xf32>
    %cst_120 = arith.constant 0.00999999977 : f32
    %467 = vector.broadcast %cst_120 : f32 to vector<8x128xf32>
    %468 = arith.mulf %467, %461 : vector<8x128xf32>
    %469 = arith.select %466, %461, %468 : vector<8x128xi1>, vector<8x128xf32>
    %cst_121 = arith.constant 0.000000e+00 : f32
    %470 = vector.broadcast %cst_121 : f32 to vector<8x128xf32>
    %471 = arith.cmpf oge, %464, %470 : vector<8x128xf32>
    %cst_122 = arith.constant 0.00999999977 : f32
    %472 = vector.broadcast %cst_122 : f32 to vector<8x128xf32>
    %473 = arith.mulf %472, %464 : vector<8x128xf32>
    %474 = arith.select %471, %464, %473 : vector<8x128xi1>, vector<8x128xf32>
    %475 = arith.truncf %469 : vector<8x128xf32> to vector<8x128xbf16>
    %476 = arith.truncf %474 : vector<8x128xf32> to vector<8x128xbf16>
    %cst_123 = arith.constant dense<0.000000e+00> : vector<24x128xf32>
    %477 = tpu.matmul %0, %475, %cst_123 {dimension_numbers = #tpu.dot_dimension_numbers<[1], [0], [0], [1], [0, 0, 1, 1], [], []>} : vector<24x8xbf16>, vector<8x128xbf16>, vector<24x128xf32> -> vector<24x128xf32>
    %cst_124 = arith.constant dense<0.000000e+00> : vector<24x128xf32>
    %478 = tpu.matmul %1, %476, %cst_124 {dimension_numbers = #tpu.dot_dimension_numbers<[1], [0], [0], [1], [0, 0, 1, 1], [], []>} : vector<24x8xbf16>, vector<8x128xbf16>, vector<24x128xf32> -> vector<24x128xf32>
    %479 = arith.addf %477, %478 : vector<24x128xf32>
    %cst_125 = arith.constant dense<0.000000e+00> : vector<24x128xf32>
    %480 = tpu.matmul %2, %475, %cst_125 {dimension_numbers = #tpu.dot_dimension_numbers<[1], [0], [0], [1], [0, 0, 1, 1], [], []>} : vector<24x8xbf16>, vector<8x128xbf16>, vector<24x128xf32> -> vector<24x128xf32>
    %cst_126 = arith.constant dense<0.000000e+00> : vector<24x128xf32>
    %481 = tpu.matmul %3, %476, %cst_126 {dimension_numbers = #tpu.dot_dimension_numbers<[1], [0], [0], [1], [0, 0, 1, 1], [], []>} : vector<24x8xbf16>, vector<8x128xbf16>, vector<24x128xf32> -> vector<24x128xf32>
    %482 = arith.addf %480, %481 : vector<24x128xf32>
    %483 = vector.broadcast %439 : vector<24x1xf32> to vector<24x128xf32>
    %484 = arith.mulf %479, %483 : vector<24x128xf32>
    %485 = arith.truncf %484 : vector<24x128xf32> to vector<24x128xbf16>
    %486 = vector.broadcast %450 : vector<24x1xf32> to vector<24x128xf32>
    %487 = arith.mulf %482, %486 : vector<24x128xf32>
    %488 = arith.truncf %487 : vector<24x128xf32> to vector<24x128xbf16>
    %cst_127 = arith.constant dense<0.000000e+00> : vector<8x128xf32>
    %489 = tpu.matmul %2, %485, %cst_127 {dimension_numbers = #tpu.dot_dimension_numbers<[0], [0], [1], [1], [0, 1, 1, 1], [], []>} : vector<24x8xbf16>, vector<24x128xbf16>, vector<8x128xf32> -> vector<8x128xf32>
    %cst_128 = arith.constant dense<0.000000e+00> : vector<8x128xf32>
    %490 = tpu.matmul %0, %488, %cst_128 {dimension_numbers = #tpu.dot_dimension_numbers<[0], [0], [1], [1], [0, 1, 1, 1], [], []>} : vector<24x8xbf16>, vector<24x128xbf16>, vector<8x128xf32> -> vector<8x128xf32>
    %491 = arith.addf %489, %490 : vector<8x128xf32>
    %cst_129 = arith.constant dense<0.000000e+00> : vector<8x128xf32>
    %492 = tpu.matmul %3, %485, %cst_129 {dimension_numbers = #tpu.dot_dimension_numbers<[0], [0], [1], [1], [0, 1, 1, 1], [], []>} : vector<24x8xbf16>, vector<24x128xbf16>, vector<8x128xf32> -> vector<8x128xf32>
    %cst_130 = arith.constant dense<0.000000e+00> : vector<8x128xf32>
    %493 = tpu.matmul %1, %488, %cst_130 {dimension_numbers = #tpu.dot_dimension_numbers<[0], [0], [1], [1], [0, 1, 1, 1], [], []>} : vector<24x8xbf16>, vector<24x128xbf16>, vector<8x128xf32> -> vector<8x128xf32>
    %494 = arith.addf %492, %493 : vector<8x128xf32>
    %cst_131 = arith.constant 0.000000e+00 : f32
    %495 = vector.broadcast %cst_131 : f32 to vector<8x128xf32>
    %496 = arith.cmpf oge, %491, %495 : vector<8x128xf32>
    %cst_132 = arith.constant 0.00999999977 : f32
    %497 = vector.broadcast %cst_132 : f32 to vector<8x128xf32>
    %498 = arith.mulf %497, %491 : vector<8x128xf32>
    %499 = arith.select %496, %491, %498 : vector<8x128xi1>, vector<8x128xf32>
    %cst_133 = arith.constant 0.000000e+00 : f32
    %500 = vector.broadcast %cst_133 : f32 to vector<8x128xf32>
    %501 = arith.cmpf oge, %494, %500 : vector<8x128xf32>
    %cst_134 = arith.constant 0.00999999977 : f32
    %502 = vector.broadcast %cst_134 : f32 to vector<8x128xf32>
    %503 = arith.mulf %502, %494 : vector<8x128xf32>
    %504 = arith.select %501, %494, %503 : vector<8x128xi1>, vector<8x128xf32>
    %505 = vector.extract_strided_slice %363 {offsets = [0, 0], sizes = [8, 128], strides = [1, 1]} : vector<16x128xf32> to vector<8x128xf32>
    %506 = arith.addf %505, %469 : vector<8x128xf32>
    %507 = arith.addf %506, %499 : vector<8x128xf32>
    %508 = vector.extract_strided_slice %363 {offsets = [8, 0], sizes = [8, 128], strides = [1, 1]} : vector<16x128xf32> to vector<8x128xf32>
    %509 = arith.addf %508, %474 : vector<8x128xf32>
    %510 = arith.addf %509, %504 : vector<8x128xf32>
    %c0_135 = arith.constant 0 : index
    %c0_136 = arith.constant 0 : index
    %511 = vector.load %arg14[%c0_135, %c0_136] : memref<16x384xf32, #tpu.memory_space<vmem>>, vector<8x128xf32>
    tpu.vector_store %arg14[%c0_135, %c0_136], %507 {strides = array<i32>} : memref<16x384xf32, #tpu.memory_space<vmem>>, vector<8x128xf32>,
    %c8 = arith.constant 8 : index
    %c0_137 = arith.constant 0 : index
    %512 = vector.load %arg14[%c8, %c0_137] : memref<16x384xf32, #tpu.memory_space<vmem>>, vector<8x128xf32>
    tpu.vector_store %arg14[%c8, %c0_137], %510 {strides = array<i32>} : memref<16x384xf32, #tpu.memory_space<vmem>>, vector<8x128xf32>,
    %c0_138 = arith.constant 0 : index
    %c128 = arith.constant 128 : index
    %513 = vector.load %arg14[%c0_138, %c128] : memref<16x384xf32, #tpu.memory_space<vmem>>, vector<8x256xf32>
    tpu.vector_store %arg14[%c0_138, %c128], %348 {strides = array<i32>} : memref<16x384xf32, #tpu.memory_space<vmem>>, vector<8x256xf32>,
    %c8_139 = arith.constant 8 : index
    %c128_140 = arith.constant 128 : index
    %514 = vector.load %arg14[%c8_139, %c128_140] : memref<16x384xf32, #tpu.memory_space<vmem>>, vector<8x256xf32>
    tpu.vector_store %arg14[%c8_139, %c128_140], %354 {strides = array<i32>} : memref<16x384xf32, #tpu.memory_space<vmem>>, vector<8x256xf32>,
    return
  }
}

</mosaic_0001>

<bundles_post_ra>
// kernel: tpu_custom_call.1
= control target key start
LH: loop header
LB: loop body
LE: loop exit
PB: predicated region body
PF: predicated region fallthrough
CT: control target
= control target key end

     0   :  { %19 = vsyncpa [#allocation3], 0  ;;  %s2946_s0 = inlined_call_operand.vmem [shape: f32[8,128], index: 0, kind: input, shape index: {}]   ;;  %s2947_s1 = inlined_call_operand.vmem [shape: f32[8,256], index: 1, kind: input, shape index: {}]   ;;  %s2948_s2 = inlined_call_operand.hbm [shape: f32[128,128], index: 2, kind: input, shape index: {}]   ;;  %s2949_s3 = inlined_call_operand.vmem [shape: f32[1,128], index: 3, kind: input, shape index: {}]   ;;  %s2950_s4 = inlined_call_operand.vmem [shape: f32[8,128], index: 4, kind: input, shape index: {}]   ;;  %s2951_s5 = inlined_call_operand.hbm [shape: f32[256,128], index: 5, kind: input, shape index: {}]   ;;  %s2952_s6 = inlined_call_operand.vmem [shape: f32[1,128], index: 6, kind: input, shape index: {}]   ;;  %s2953_s7 = inlined_call_operand.vmem [shape: f32[8,128], index: 7, kind: input, shape index: {}]   ;;  %s2954_s8 = inlined_call_operand.vmem [shape: f32[16,128], index: 8, kind: input, shape index: {}]   ;;  %s2955_s9 = inlined_call_operand.vmem [shape: f32[16,2], index: 9, kind: input, shape index: {}]   ;;  %s2956_s10 = inlined_call_operand.vmem [shape: bf16[24,8], index: 10, kind: input, shape index: {}]   ;;  %s2957_s11 = inlined_call_operand.vmem [shape: bf16[24,8], index: 11, kind: input, shape index: {}]   ;;  %s2958_s12 = inlined_call_operand.vmem [shape: bf16[24,8], index: 12, kind: input, shape index: {}]   ;;  %s2959_s13 = inlined_call_operand.vmem [shape: bf16[24,8], index: 13, kind: input, shape index: {}]   ;;  %s2960_s14 = inlined_call_operand.hbm [shape: f32[16,384], index: 14, kind: output, shape index: {}]  }
   0x1   :  { %20 = vsyncpa [#allocation6], 0 }
   0x2   :  { %21 = vsyncpa [#allocation4], 0  ;;  %s30_s15 = sshll.u32 %s2948_s2, 4  ;;  %s2210_s16 = smov [#allocation2]   ;;  %s31_s15 = int_to_ptr.hbm [resolvable:$true] %s30_s15 }
   0x3   :  { %s32_s17 = sshll.u32 %s2210_s16, 4  ;;  %s47_s20 = sshll.u32 %s2951_s5, 4  ;;  %s33_s17 = int_to_ptr.vmem [resolvable:$true] %s32_s17  ;;  %s48_s20 = int_to_ptr.hbm [resolvable:$true] %s47_s20 }
   0x4   :  { %s2211_s21 = smov 128   ;;  %s2212_s22 = smov 8  }
   0x5   :  { %38 = dma.hbm_to_vmem [thread:$0]  %s31_s15, 2048, %s33_s17, [#allocation3], %s2211_s21, %s2211_s21, %s2212_s22  }
   0x6   :  { %s2213_s23 = smov [#allocation5]  }
   0x7   :  { %s49_s24 = sshll.u32 %s2213_s23, 4  ;;  %s50_s24 = int_to_ptr.vmem [resolvable:$true] %s49_s24 }
   0x8   :  { %55 = dma.hbm_to_vmem [thread:$0]  %s48_s20, 4096, %s50_s24, [#allocation6], %s2211_s21, %s2211_s21, %s2212_s22  }
   0x9   :  { %2204 = dma.done.wait [#allocation3], 2048  }
   0xa   :  { %2205 = vsyncadd [#allocation3], 4294965248 }
   0xb   :  { %2206 = dma.done.wait [#allocation6], 4096  }
   0xc   :  { %2207 = vsyncadd [#allocation6], 4294963200  ;;  %v112_v0 = vld [vmem:[#allocation2 + $0x78] sm:$0xff]  ;;  %v111_v1 = vld [vmem:[#allocation2 + $0x70] sm:$0xff]  ;;  %vm300_vm5 = vcmask 1043456   ;;  %vm293_vm6 = vcmask 64512  }
   0xd   :  { %v188_v2 = vld [vmem:[#allocation5 + $0xf8] sm:$0xff]  ;;  %117 = vmatpush.msra.mxu0 %v112_v0  ;;  %v187_v3 = vld [vmem:[#allocation5 + $0xf0] sm:$0xff]  ;;  %v110_v4 = vld [vmem:[#allocation2 + $0x68] sm:$0xff]  ;;  %s2219_s19 = smov [#allocation7]   ;;  %s1917_s23 = sshll.u32 %s2960_s14, 4  ;;  %s1918_s23 = int_to_ptr.hbm [resolvable:$true] %s1917_s23 }
   0xe   :  { %213 = vmatpush.msra.mxu2 %v188_v2  ;;  %v172_v5 = vld [vmem:[#allocation5 + $0x78] sm:$0xff]  ;;  %v186_v6 = vld [vmem:[#allocation5 + $0xe8] sm:$0xff]  ;;  %v171_v7 = vld [vmem:[#allocation5 + $0x70] sm:$0xff]  ;;  %s1915_s20 = sshll.u32 %s2219_s19, 4  ;;  %s2220_s24 = smov 384   ;;  %s1916_s20 = int_to_ptr.vmem [resolvable:$true] %s1915_s20 }
   0xf   :  { %118 = vmatpush.msra.mxu0 %v111_v1  ;;  %v109_v8 = vld [vmem:[#allocation2 + $0x60] sm:$0xff]  ;;  %193 = vmatpush.msra.mxu1 %v172_v5  ;;  %v170_v10 = vld [vmem:[#allocation5 + $0x68] sm:$0xff]  ;;  %v108_v11 = vld [vmem:[#allocation2 + $0x58] sm:$0xff]  ;;  %s2221_s2 = smov 24  }
  0x10   :  { %214 = vmatpush.msra.mxu2 %v187_v3  ;;  %v185_v9 = vld [vmem:[#allocation5 + $0xe0] sm:$0xff]  ;;  %v184_v12 = vld [vmem:[#allocation5 + $0xd8] sm:$0xff]  ;;  %v107_v14 = vld [vmem:[#allocation2 + $0x50] sm:$0xff] }
  0x11   :  { %119 = vmatpush.msra.mxu0 %v110_v4  ;;  %194 = vmatpush.msra.mxu1 %v171_v7  ;;  %v169_v13 = vld [vmem:[#allocation5 + $0x60] sm:$0xff]  ;;  %v183_v15 = vld [vmem:[#allocation5 + $0xd0] sm:$0xff]  ;;  %v168_v16 = vld [vmem:[#allocation5 + $0x58] sm:$0xff] }
  0x12   :  { %215 = vmatpush.msra.mxu2 %v186_v6  ;;  %v106_v17 = vld [vmem:[#allocation2 + $0x48] sm:$0xff]  ;;  %v167_v19 = vld [vmem:[#allocation5 + $0x50] sm:$0xff]  ;;  %v105_v20 = vld [vmem:[#allocation2 + $0x40] sm:$0xff] }
  0x13   :  { %120 = vmatpush.msra.mxu0 %v109_v8  ;;  %195 = vmatpush.msra.mxu1 %v170_v10  ;;  %v182_v18 = vld [vmem:[#allocation5 + $0xc8] sm:$0xff]  ;;  %v181_v21 = vld [vmem:[#allocation5 + $0xc0] sm:$0xff]  ;;  %v104_v23 = vld [vmem:[#allocation2 + $0x38] sm:$0xff] }
  0x14   :  { %216 = vmatpush.msra.mxu2 %v185_v9  ;;  %v166_v22 = vld [vmem:[#allocation5 + $0x48] sm:$0xff]  ;;  %v180_v24 = vld [vmem:[#allocation5 + $0xb8] sm:$0xff]  ;;  %v165_v25 = vld [vmem:[#allocation5 + $0x40] sm:$0xff] }
  0x15   :  { %121 = vmatpush.msra.mxu0 %v108_v11  ;;  %196 = vmatpush.msra.mxu1 %v169_v13  ;;  %v103_v26 = vld [vmem:[#allocation2 + $0x30] sm:$0xff]  ;;  %v164_v28 = vld [vmem:[#allocation5 + $0x38] sm:$0xff]  ;;  %v102_v29 = vld [vmem:[#allocation2 + $0x28] sm:$0xff] }
  0x16   :  { %217 = vmatpush.msra.mxu2 %v184_v12  ;;  %v179_v27 = vld [vmem:[#allocation5 + $0xb0] sm:$0xff]  ;;  %v178_v30 = vld [vmem:[#allocation5 + $0xa8] sm:$0xff]  ;;  %v101_v32 = vld [vmem:[#allocation2 + $0x20] sm:$0xff] }
  0x17   :  { %122 = vmatpush.msra.mxu0 %v107_v14  ;;  %197 = vmatpush.msra.mxu1 %v168_v16  ;;  %v163_v31 = vld [vmem:[#allocation5 + $0x30] sm:$0xff]  ;;  %v177_v33 = vld [vmem:[#allocation5 + $0xa0] sm:$0xff]  ;;  %v162_v34 = vld [vmem:[#allocation5 + $0x28] sm:$0xff] }
  0x18   :  { %218 = vmatpush.msra.mxu2 %v183_v15  ;;  %v100_v35 = vld [vmem:[#allocation2 + $0x18] sm:$0xff]  ;;  %v161_v37 = vld [vmem:[#allocation5 + $0x20] sm:$0xff]  ;;  %v99_v38 = vld [vmem:[#allocation2 + $0x10] sm:$0xff] }
  0x19   :  { %123 = vmatpush.msra.mxu0 %v106_v17  ;;  %198 = vmatpush.msra.mxu1 %v167_v19  ;;  %v176_v36 = vld [vmem:[#allocation5 + $0x98] sm:$0xff]  ;;  %v175_v39 = vld [vmem:[#allocation5 + $0x90] sm:$0xff]  ;;  %v98_v41 = vld [vmem:[#allocation2 + $0x8] sm:$0xff] }
  0x1a   :  { %219 = vmatpush.msra.mxu2 %v182_v18  ;;  %v160_v40 = vld [vmem:[#allocation5 + $0x18] sm:$0xff]  ;;  %v174_v42 = vld [vmem:[#allocation5 + $0x88] sm:$0xff]  ;;  %v159_v43 = vld [vmem:[#allocation5 + $0x10] sm:$0xff] }
  0x1b   :  { %124 = vmatpush.msra.mxu0 %v105_v20  ;;  %199 = vmatpush.msra.mxu1 %v166_v22  ;;  %v97_v44 = vld [vmem:[#allocation2] sm:$0xff]  ;;  %v156_v47 = vld [vmem:[%s2947_s1 + $0x8] sm:$0xff] }
  0x1c   :  { %220 = vmatpush.msra.mxu2 %v181_v21  ;;  %v173_v45 = vld [vmem:[#allocation5 + $0x80] sm:$0xff]  ;;  %v158_v48 = vld [vmem:[#allocation5 + $0x8] sm:$0xff] }
  0x1d   :  { %125 = vmatpush.msra.mxu0 %v104_v23  ;;  %200 = vmatpush.msra.mxu1 %v165_v25  ;;  %v96_v46 = vld [vmem:[%s2946_s0] sm:$0xff] }
  0x1e   :  { %221 = vmatpush.msra.mxu2 %v180_v24  ;;  %v157_v49 = vld [vmem:[#allocation5] sm:$0xff] }
  0x1f   :  { %126 = vmatpush.msra.mxu0 %v103_v26  ;;  %201 = vmatpush.msra.mxu1 %v164_v28  ;;  %v155_v50 = vld [vmem:[%s2947_s1] sm:$0xff] }
  0x20   :  { %222 = vmatpush.msra.mxu2 %v179_v27  ;;  %v251_v51 = vld [vmem:[%s2950_s4] sm:$0xff] }
  0x21   :  { %127 = vmatpush.msra.mxu0 %v102_v29  ;;  %202 = vmatpush.msra.mxu1 %v163_v31  ;;  %v252_v52 = vmul.f32 %v251_v51, %v251_v51  ;;  %v2318_v53 = vld [vmem:[%s2953_s7] sm:$0xff]  ;;  %s2216_s7 = smov 2  }
  0x22   :  { %223 = vmatpush.msra.mxu2 %v178_v30  ;;  %v268_v54 = vmul.f32 %v2318_v53, %v2318_v53  ;;  %v2062_v55 = vld [vmem:[%s2949_s3] ss:$0 sm:$0xff] }
  0x23   :  { %128 = vmatpush.msra.mxu0 %v101_v32  ;;  %203 = vmatpush.msra.mxu1 %v162_v34  ;;  %v2063_v58 = vld [vmem:[%s2952_s6] ss:$0 sm:$0xff] }
  0x24   :  { %224 = vmatpush.msra.mxu2 %v177_v33  ;;  %253 = vadd.xlane.f32.xlu1 %v252_v52  ;;  %v2336_v24 = vld [vmem:[%s2956_s10] sm:$0xff] }
  0x25   :  { %129 = vmatpush.msra.mxu0 %v100_v35  ;;  %204 = vmatpush.msra.mxu1 %v161_v37  ;;  %v2348_v37 = vld [vmem:[%s2957_s11] sm:$0xff] }
  0x26   :  { %225 = vmatpush.msra.mxu2 %v176_v36 }
  0x27   :  { %130 = vmatpush.msra.mxu0 %v99_v38  ;;  %205 = vmatpush.msra.mxu1 %v160_v40  ;;  %v2353_v38 = vld [vmem:[%s2959_s13] sm:$0xff] }
  0x28   :  { %226 = vmatpush.msra.mxu2 %v175_v39 }
  0x29   :  { %131 = vmatpush.msra.mxu0 %v98_v41  ;;  %206 = vmatpush.msra.mxu1 %v159_v43  ;;  %v83_v43 = vld [vmem:[%s2956_s10 + $0x8] sm:$0xf] }
  0x2a   :  { %227 = vmatpush.msra.mxu2 %v174_v42 }
  0x2b   :  { %132 = vmatpush.msra.mxu0 %v97_v44  ;;  %207 = vmatpush.msra.mxu1 %v158_v48 }
  0x2c   :  { %228 = vmatpush.msra.mxu2 %v173_v45  ;;  %133 = vmatmul.f32.vlgmr.msra.gmra.mxu0 %v96_v46  ;;  %v400_v45 = vunpack.c.l.b16 %v83_v43 }
  0x2d   :  { %229 = vmatmul.f32.vlgmr.msra.gmra.mxu2 %v156_v47  ;;  %208 = vmatpush.msra.mxu1 %v157_v49  ;;  %v86_v49 = vld [vmem:[%s2957_s11 + $0x8] sm:$0xf] }
  0x2e   :  { %209 = vmatmul.f32.vlgmr.msra.gmra.mxu1 %v155_v50  ;;  %269 = vadd.xlane.f32.xlu1 %v268_v54  ;;  %v2366_v47 = vpack.c.b16 %v400_v45, %v400_v45  ;;  %v92_v50 = vld [vmem:[%s2959_s13 + $0x8] sm:$0xf] }
  0x2f   :  { %v348_v52 = vunpack.c.l.b16 %v92_v50 }
  0x97   :  { %v254_v5 = vpop.xlane.xlu1 %253 }
  0x98   :  { %v255_v6 = vmax.f32 %v254_v5, 1e-24 }
  0x9a   :  { %2064 = vrsqrt.f32 %v255_v6  ;;  %vm262_vm2 = vweird.f32 %v255_v6 }
  0xa0   :  { %v2065_v7 = vpop.eup %2064 }
  0xa1   :  { %v257_v8 = vmul.f32 %v2065_v7, %v255_v6  ;;  %vm263_vm3 = vweird.f32 %v2065_v7  ;;  %v270_v42 = vpop.xlane.xlu1 %269 }
  0xa2   :  { %vm264_vm4 = vmor %vm262_vm2, %vm263_vm3  ;;  %v271_v44 = vmax.f32 %v270_v42, 1e-24  ;;  %vm581_vm2 = vcmask 195584  }
  0xa3   :  { %v258_v9 = vmul.f32 %v2065_v7, %v257_v8 }
  0xa4   :  { %vm278_vm13 = vweird.f32 %v271_v44 }
  0xa5   :  { %v259_v10 = vmul.f32 0.5, %v258_v9 }
  0xa7   :  { %v260_v11 = vsub.f32 1.5, %v259_v10 }
  0xa9   :  { %v134_v56 = vpop.f32.mrf.mxu0  ;;  %v261_v12 = vmul.f32 %v2065_v7, %v260_v11 }
  0xaa   :  { %v135_v57 = vadd.f32 %v2062_v55, %v134_v56 }
  0xab   :  { %v210_v60 = vpop.f32.mrf.mxu1  ;;  %v265_v13 = vsel %vm264_vm4, %v2065_v7, %v261_v12 }
  0xac   :  { %vm137_vm0 = vcmp.ge.f32.partialorder %v135_v57, 0.0  ;;  %v138_v59 = vmul.f32 0.01, %v135_v57  ;;  %v211_v61 = vadd.f32 %v2063_v58, %v210_v60  ;;  %v2328_v15 = vmul.f32 %v265_v13, %v251_v51 }
  0xad   :  { %v290_v51 = vunpack.c.l.b16 %v86_v49 }
  0xae   :  { %v139_v62 = vsel %vm137_vm0, %v135_v57, %v138_v59  ;;  %v393_v17 = vpack.c.bf16 %v2328_v15, %v2328_v15  ;;  %v2381_v57 = vpack.c.b16 %v348_v52, %v348_v52 }
  0xaf   :  { %v140_v0 = vmul.f32 %v139_v62, %v139_v62  ;;  %v2379_v56 = vpack.c.b16 %v290_v51, %v290_v51 }
  0xb0   :  { %v230_v63 = vpop.f32.mrf.mxu2  ;;  %v410_v18 = vsel %vm300_vm5, %v393_v17, 0 }
  0xb1   :  { %v231_v1 = vadd.f32 %v230_v63, %v211_v61  ;;  %141 = vadd.xlane.f32.xlu0 %v140_v0  ;;  %422 = vmatpush.bf16.msrb.mxu2 %v410_v18 }
  0xb3   :  { %v234_v2 = vmul.f32 0.01, %v231_v1  ;;  %vm233_vm1 = vcmp.ge.f32.partialorder %v231_v1, 0.0 }
  0xb4   :  { %1951 = vmatmul.msk.bf16.vlgmr.msrb.gmra.mxu2 %vm293_vm6, %v2336_v24 }
  0xb5   :  { %v235_v3 = vsel %vm233_vm1, %v231_v1, %v234_v2  ;;  %v2398_v2 = vld [vmem:[%s2958_s12] sm:$0xff] }
  0xb6   :  { %v236_v4 = vmul.f32 %v235_v3, %v235_v3 }
  0xb9   :  { %237 = vadd.xlane.f32.xlu0 %v236_v4 }
  0xc4   :  { %1952 = vmatmul.msk.bf16.gmra.mxu2 %vm293_vm6, %v2366_v47 }
 0x124   :  { %v142_v14 = vpop.xlane.xlu0 %141 }
 0x125   :  { %v143_v16 = vmax.f32 %v142_v14, 1e-24 }
 0x127   :  { %2066 = vrsqrt.f32 %v143_v16  ;;  %vm150_vm8 = vweird.f32 %v143_v16 }
 0x12c   :  { %v238_v19 = vpop.xlane.xlu0 %237 }
 0x12d   :  { %v2067_v20 = vpop.eup %2066  ;;  %v239_v21 = vmax.f32 %v238_v19, 1e-24 }
 0x12e   :  { %v145_v22 = vmul.f32 %v2067_v20, %v143_v16  ;;  %vm151_vm7 = vweird.f32 %v2067_v20 }
 0x12f   :  { %2068 = vrsqrt.f32 %v239_v21  ;;  %vm152_vm9 = vmor %vm150_vm8, %vm151_vm7  ;;  %vm246_vm10 = vweird.f32 %v239_v21 }
 0x130   :  { %v146_v23 = vmul.f32 %v2067_v20, %v145_v22  ;;  %2070 = vrsqrt.f32 %v271_v44 }
 0x132   :  { %v147_v25 = vmul.f32 0.5, %v146_v23 }
 0x134   :  { %v148_v26 = vsub.f32 1.5, %v147_v25 }
 0x135   :  { %v2069_v27 = vpop.eup %2068 }
 0x136   :  { %v241_v28 = vmul.f32 %v2069_v27, %v239_v21  ;;  %v149_v29 = vmul.f32 %v2067_v20, %v148_v26  ;;  %vm247_vm11 = vweird.f32 %v2069_v27  ;;  %v2071_v54 = vpop.eup %2070 }
 0x137   :  { %vm248_vm12 = vmor %vm246_vm10, %vm247_vm11  ;;  %v273_v55 = vmul.f32 %v2071_v54, %v271_v44  ;;  %vm279_vm14 = vweird.f32 %v2071_v54  ;;  %v424_v5 = vpop.f32.mrf.mxu2 }
 0x138   :  { %v242_v30 = vmul.f32 %v2069_v27, %v241_v28  ;;  %v153_v31 = vsel %vm152_vm9, %v2067_v20, %v149_v29  ;;  %vm280_vm15 = vmor %vm278_vm13, %vm279_vm14 }
 0x139   :  { %v2340_v32 = vmul.f32 %v153_v31, %v139_v62  ;;  %v274_v58 = vmul.f32 %v2071_v54, %v273_v55 }
 0x13a   :  { %v243_v33 = vmul.f32 0.5, %v242_v30 }
 0x13b   :  { %v283_v34 = vpack.c.bf16 %v2340_v32, %v2340_v32  ;;  %v275_v59 = vmul.f32 0.5, %v274_v58 }
 0x13c   :  { %v244_v35 = vsub.f32 1.5, %v243_v33 }
 0x13d   :  { %v302_v36 = vsel %vm300_vm5, %v283_v34, 0  ;;  %v276_v60 = vsub.f32 1.5, %v275_v59 }
 0x13e   :  { %314 = vmatpush.bf16.msra.mxu3 %v302_v36  ;;  %364 = vmatpush.bf16.msrb.mxu0 %v302_v36  ;;  %v245_v39 = vmul.f32 %v2069_v27, %v244_v35 }
 0x13f   :  { %v277_v61 = vmul.f32 %v2071_v54, %v276_v60  ;;  %v426_v8 = vpop.f32.mrf.mxu2 }
 0x140   :  { %v249_v40 = vsel %vm248_vm12, %v2069_v27, %v245_v39 }
 0x141   :  { %1935 = vmatmul.msk.bf16.vlgmr.msra.gmra.mxu3 %vm293_vm6, %v2348_v37  ;;  %1943 = vmatmul.msk.bf16.vlgmr.msrb.gmra.mxu0 %vm293_vm6, %v2353_v38  ;;  %v2359_v41 = vmul.f32 %v249_v40, %v235_v3  ;;  %v281_v62 = vsel %vm280_vm15, %v2071_v54, %v277_v61 }
 0x142   :  { %472 = vmatpush.bf16.msra.mxu0 %v410_v18  ;;  %v2388_v63 = vmul.f32 %v281_v62, %v2318_v53  ;;  %v89_v53 = vld [vmem:[%s2958_s12 + $0x8] sm:$0xf] }
 0x143   :  { %v284_v46 = vpack.c.bf16 %v2359_v41, %v2359_v41  ;;  %v456_v3 = vunpack.c.l.b16 %v89_v53 }
 0x144   :  { %v394_v0 = vpack.c.bf16 %v2388_v63, %v2388_v63 }
 0x145   :  { %v305_v48 = vsel %vm300_vm5, %v284_v46, 0  ;;  %v2409_v4 = vpack.c.b16 %v456_v3, %v456_v3 }
 0x146   :  { %332 = vmatpush.bf16.msrb.mxu3 %v305_v48  ;;  %382 = vmatpush.bf16.msrb.mxu1 %v305_v48  ;;  %v413_v1 = vsel %vm300_vm5, %v394_v0, 0 }
 0x147   :  { %v429_v12 = vpop.f32.mrf.mxu2 }
 0x149   :  { %1945 = vmatmul.msk.bf16.vlgmr.msrb.gmra.mxu1 %vm293_vm6, %v2353_v38 }
 0x14a   :  { %440 = vmatpush.bf16.msra.mxu3 %v413_v1  ;;  %490 = vmatpush.bf16.msra.mxu1 %v413_v1 }
 0x14f   :  { %v431_v17 = vpop.f32.mrf.mxu2 }
 0x151   :  { %1936 = vmatmul.msk.bf16.gmra.mxu3 %vm293_vm6, %v2379_v56  ;;  %1944 = vmatmul.msk.bf16.gmra.mxu0 %vm293_vm6, %v2381_v57 }
 0x159   :  { %1946 = vmatmul.msk.bf16.gmra.mxu1 %vm293_vm6, %v2381_v57 }
 0x161   :  { %1937 = vmatmul.msk.bf16.vlgmr.msrb.gmra.mxu3 %vm293_vm6, %v2348_v37  ;;  %1959 = vmatmul.msk.bf16.vlgmr.msra.gmra.mxu0 %vm293_vm6, %v2398_v2 }
 0x169   :  { %1961 = vmatmul.msk.bf16.vlgmr.msra.gmra.mxu1 %vm293_vm6, %v2398_v2 }
 0x171   :  { %1938 = vmatmul.msk.bf16.gmra.mxu3 %vm293_vm6, %v2379_v56  ;;  %1960 = vmatmul.msk.bf16.gmra.mxu0 %vm293_vm6, %v2409_v4 }
 0x179   :  { %1962 = vmatmul.msk.bf16.gmra.mxu1 %vm293_vm6, %v2409_v4 }
 0x181   :  { %1953 = vmatmul.msk.bf16.vlgmr.msra.gmra.mxu3 %vm293_vm6, %v2336_v24 }
 0x191   :  { %1954 = vmatmul.msk.bf16.gmra.mxu3 %vm293_vm6, %v2366_v47 }
 0x1be   :  { %v2421_v6 = vpop.f32.mrf.mxu0 }
 0x1c4   :  { %v2423_v7 = vpop.f32.mrf.mxu3 }
 0x1c5   :  { %v425_v21 = vadd.f32 %v424_v5, %v2423_v7 }
 0x1c6   :  { %v2425_v9 = vpop.f32.mrf.mxu0  ;;  %v2427_v10 = vpop.f32.mrf.mxu1 }
 0x1cc   :  { %v2429_v11 = vpop.f32.mrf.mxu3 }
 0x1cd   :  { %v427_v30 = vadd.f32 %v426_v8, %v2429_v11 }
 0x1ce   :  { %v2431_v13 = vpop.f32.mrf.mxu0  ;;  %v2433_v14 = vpop.f32.mrf.mxu1 }
 0x1d4   :  { %v2435_v16 = vpop.f32.mrf.mxu3 }
 0x1d5   :  { %v430_v35 = vadd.f32 %v429_v12, %v2435_v16 }
 0x1d6   :  { %v373_v18 = vpop.f32.mrf.mxu0  ;;  %v2437_v19 = vpop.f32.mrf.mxu1 }
 0x1dc   :  { %v323_v20 = vpop.f32.mrf.mxu3 }
 0x1de   :  { %v474_v22 = vpop.f32.mrf.mxu0  ;;  %v391_v23 = vpop.f32.mrf.mxu1 }
 0x1df   :  { %v475_v25 = vadd.f32 %v474_v22, %v2421_v6 }
 0x1e1   :  { %v501_v26 = vmul.f32 %v475_v25, %v425_v21 }
 0x1e3   :  { %507 = vadd.xlane.f32.xlu0 %v501_v26 }
 0x1e4   :  { %v2441_v27 = vpop.f32.mrf.mxu3 }
 0x1e6   :  { %v476_v28 = vpop.f32.mrf.mxu0  ;;  %v492_v29 = vpop.f32.mrf.mxu1 }
 0x1e7   :  { %v477_v31 = vadd.f32 %v476_v28, %v2425_v9  ;;  %v493_v62 = vadd.f32 %v492_v29, %v2427_v10 }
 0x1e9   :  { %v503_v33 = vmul.f32 %v477_v31, %v427_v30 }
 0x1eb   :  { %509 = vadd.xlane.f32.xlu1 %v503_v33 }
 0x1ec   :  { %v2445_v34 = vpop.f32.mrf.mxu3 }
 0x1ee   :  { %v479_v36 = vpop.f32.mrf.mxu0  ;;  %v494_v39 = vpop.f32.mrf.mxu1 }
 0x1ef   :  { %v480_v40 = vadd.f32 %v479_v36, %v2431_v13  ;;  %v495_v50 = vadd.f32 %v494_v39, %v2433_v14  ;;  %v93_v36 = vlaneseq }
 0x1f1   :  { %v505_v42 = vmul.f32 %v480_v40, %v430_v35 }
 0x1f3   :  { %511 = vadd.xlane.f32.xlu2 %v505_v42  ;;  %v2463_v42 = vand.u32 127, %v93_v36 }
 0x1f4   :  { %v2449_v43 = vpop.f32.mrf.mxu3 }
 0x1f5   :  { %vm549_vm0 = vcmp.eq.s32.totalorder %v2463_v42, 0  ;;  %vm553_vm1 = vcmp.eq.s32.totalorder %v2463_v42, 1 }
 0x1f6   :  { %v497_v44 = vpop.f32.mrf.mxu1  ;;  %v481_v45 = vpop.f32.mrf.mxu0 }
 0x1f7   :  { %v498_v55 = vadd.f32 %v497_v44, %v2437_v19 }
 0x1fc   :  { %v341_v46 = vpop.f32.mrf.mxu3 }
 0x1fe   :  { %v499_v48 = vpop.f32.mrf.mxu1 }
 0x204   :  { %v442_v49 = vpop.f32.mrf.mxu3 }
 0x205   :  { %v443_v61 = vadd.f32 %v442_v49, %v2441_v27 }
 0x207   :  { %v502_v1 = vmul.f32 %v493_v62, %v443_v61 }
 0x20c   :  { %v444_v51 = vpop.f32.mrf.mxu3 }
 0x20d   :  { %v2453_v52 = vadd.f32 %v444_v51, %v2445_v34 }
 0x20f   :  { %v504_v54 = vmul.f32 %v495_v50, %v2453_v52 }
 0x211   :  { %521 = vadd.xlane.f32.xlu0 %v504_v54 }
 0x214   :  { %v447_v58 = vpop.f32.mrf.mxu3 }
 0x215   :  { %v448_v59 = vadd.f32 %v447_v58, %v2449_v43 }
 0x217   :  { %v506_v60 = vmul.f32 %v498_v55, %v448_v59 }
 0x219   :  { %523 = vadd.xlane.f32.xlu2 %v506_v60 }
 0x21c   :  { %v449_v0 = vpop.f32.mrf.mxu3 }
 0x221   :  { %519 = vadd.xlane.f32.xlu2 %v502_v1 }
 0x225   :  { %565 = vxpose.xlu1.c.b16.start [1/2] (short) (narrow) %v2398_v2, 16 }
 0x235   :  { %566 = vxpose.xlu1.c.b16.end [2/2] (short) (narrow) %v2409_v4, 16 }
 0x256   :  { %v508_v3 = vpop.xlane.xlu0 %507 }
 0x257   :  { %v513_v17 = vmul.f32 1.442695, %v508_v3 }
 0x25e   :  { %v510_v53 = vpop.xlane.xlu1 %509 }
 0x25f   :  { %v515_v5 = vmul.f32 1.442695, %v510_v53 }
 0x266   :  { %v512_v8 = vpop.xlane.xlu2 %511 }
 0x267   :  { %v517_v12 = vmul.f32 1.442695, %v512_v8 }
 0x269   :  { %2072 = vpow2.f32 %v517_v12  ;;  %v2214_v12 = vmov 1  }
 0x26a   :  { %2074 = vpow2.f32 %v515_v5  ;;  %2046 = vset.pattern.permute.xlu0 %v2214_v12 }
 0x26b   :  { %2076 = vpow2.f32 %v513_v17 }
 0x26f   :  { %v2073_v18 = vpop.eup %2072 }
 0x270   :  { %v2075_v20 = vpop.eup %2074  ;;  %v547_v22 = vmul.f32 %v2073_v18, %v430_v35  ;;  %v552_v46 = vsel %vm549_vm0, %v2073_v18, 0.0 }
 0x271   :  { %v2077_v23 = vpop.eup %2076  ;;  %v545_v26 = vmul.f32 %v2075_v20, %v427_v30  ;;  %v551_v62 = vsel %vm549_vm0, %v2075_v20, 0.0 }
 0x272   :  { %v560_v25 = vpack.c.bf16 %v547_v22, %v547_v22  ;;  %v543_v29 = vmul.f32 %v2077_v23, %v425_v21  ;;  %v550_v60 = vsel %vm549_vm0, %v2077_v23, 0.0 }
 0x274   :  { %v586_v28 = vsel %vm300_vm5, %v560_v25, 0  ;;  %v557_v31 = vpack.c.bf16 %v545_v26, %v543_v29 }
 0x275   :  { %600 = vmatpush.bf16.msra.mxu2 %v586_v28 }
 0x279   :  { %601 = vmatpush.bf16.msra.mxu2 %v557_v31 }
 0x284   :  { %v522_v40 = vpop.xlane.xlu0 %521 }
 0x285   :  { %v527_v44 = vmul.f32 1.442695, %v522_v40 }
 0x28c   :  { %v524_v33 = vpop.xlane.xlu2 %523 }
 0x28d   :  { %v529_v39 = vmul.f32 1.442695, %v524_v33 }
 0x28f   :  { %2078 = vpow2.f32 %v529_v39 }
 0x290   :  { %2080 = vpow2.f32 %v527_v44 }
 0x294   :  { %v520_v45 = vpop.xlane.xlu2 %519 }
 0x295   :  { %v2079_v35 = vpop.eup %2078  ;;  %v525_v30 = vmul.f32 1.442695, %v520_v45 }
 0x296   :  { %v556_v21 = vsel %vm553_vm1, %v2079_v35, %v552_v46  ;;  %v548_v48 = vmul.f32 %v2079_v35, %v448_v59  ;;  %v2081_v55 = vpop.eup %2080 }
 0x297   :  { %2082 = vpow2.f32 %v525_v30  ;;  %v562_v49 = vpack.c.bf16 %v556_v21, %v556_v21  ;;  %v555_v0 = vsel %vm553_vm1, %v2081_v55, %v551_v62  ;;  %v546_v53 = vmul.f32 %v2081_v55, %v2453_v52 }
 0x298   :  { %v561_v50 = vpack.c.bf16 %v548_v48, %v548_v48  ;;  %v2215_v52 = vmov 0  }
 0x299   :  { %v592_v51 = vsel %vm300_vm5, %v562_v49, 0  ;;  %2045 = vset.pattern.permute.xlu2 %v2215_v52 }
 0x29a   :  { %626 = vmatpush.bf16.msrb.mxu3 %v592_v51  ;;  %v589_v54 = vsel %vm300_vm5, %v561_v50, 0 }
 0x29b   :  { %613 = vmatpush.bf16.msrb.mxu2 %v589_v54 }
 0x29d   :  { %v2083_v58 = vpop.eup %2082 }
 0x29e   :  { %v554_v59 = vsel %vm553_vm1, %v2083_v58, %v550_v60  ;;  %v544_v1 = vmul.f32 %v2083_v58, %v443_v61 }
 0x29f   :  { %v559_v3 = vpack.c.bf16 %v555_v0, %v554_v59 }
 0x2a0   :  { %v558_v5 = vpack.c.bf16 %v546_v53, %v544_v1 }
 0x2a1   :  { %627 = vmatpush.bf16.msrb.mxu3 %v559_v3 }
 0x2a2   :  { %614 = vmatpush.bf16.msrb.mxu2 %v558_v5 }
 0x2d1   :  { %v2482_v8 = vpop.trf.xlu1 }
 0x2d2   :  { %1963 = vmatmul.msk.bf16.vlgmr.msra.gmra.mxu2 %vm581_vm2, %v2482_v8  ;;  %1965 = vmatmul.msk.bf16.vlgmr.msrb.gmra.mxu3 %vm581_vm2, %v2482_v8 }
 0x2e2   :  { %1964 = vmatmul.msk.bf16.vlgmr.msrb.gmra.mxu2 %vm581_vm2, %v2482_v8 }
 0x355   :  { %v603_v61 = vpop.f32.mrf.mxu2  ;;  %v629_v17 = vpop.f32.mrf.mxu3 }
 0x356   :  { %v633_v18 = vadd.f32 1e-16, %v629_v17 }
 0x358   :  { %2084 = vrcp.f32 %v633_v18 }
 0x35d   :  { %v605_v20 = vpop.f32.mrf.mxu2  ;;  %v631_v22 = vpop.f32.mrf.mxu3 }
 0x35e   :  { %v2085_v23 = vpop.eup %2084 }
 0x35f   :  { %641 = vperm.xlu0 %2046, %v2085_v23   ;;  %637 = vperm.xlu2 %2045, %v2085_v23  }
 0x365   :  { %v616_v25 = vpop.f32.mrf.mxu2 }
 0x36d   :  { %v618_v26 = vpop.f32.mrf.mxu2 }
 0x3b9   :  { %v638_v28 = vpop.permute.xlu2 %637 }
 0x3ba   :  { %v646_v29 = vmul.f32 %v638_v28, %v603_v61 }
 0x3bc   :  { %v648_v31 = vadd.f32 %v646_v29, %v2328_v15 }
 0x3be   :  { %v650_v33 = vmul.f32 %v648_v31, %v648_v31 }
 0x3c0   :  { %651 = vadd.xlane.f32.xlu2 %v650_v33 }
 0x3d1   :  { %v642_v36 = vpop.permute.xlu0 %641 }
 0x3d2   :  { %v647_v39 = vmul.f32 %v642_v36, %v616_v25 }
 0x3d4   :  { %v649_v40 = vadd.f32 %v647_v39, %v2388_v63 }
 0x3d6   :  { %v653_v44 = vmul.f32 %v649_v40, %v649_v40 }
 0x3d8   :  { %654 = vadd.xlane.f32.xlu0 %v653_v44 }
 0x433   :  { %v652_v45 = vpop.xlane.xlu2 %651 }
 0x434   :  { %v656_v35 = vmax.f32 %v652_v45, 1e-24 }
 0x436   :  { %2086 = vrsqrt.f32 %v656_v35  ;;  %vm663_vm4 = vweird.f32 %v656_v35 }
 0x43c   :  { %v2087_v30 = vpop.eup %2086 }
 0x43d   :  { %v658_v46 = vmul.f32 %v2087_v30, %v656_v35  ;;  %vm664_vm3 = vweird.f32 %v2087_v30 }
 0x43e   :  { %vm665_vm7 = vmor %vm663_vm4, %vm664_vm3 }
 0x43f   :  { %v659_v21 = vmul.f32 %v2087_v30, %v658_v46 }
 0x441   :  { %v660_v48 = vmul.f32 0.5, %v659_v21 }
 0x443   :  { %v661_v49 = vsub.f32 1.5, %v660_v48 }
 0x445   :  { %v662_v50 = vmul.f32 %v2087_v30, %v661_v49 }
 0x447   :  { %v666_v15 = vsel %vm665_vm7, %v2087_v30, %v662_v50  ;;  %vm1382_vm7 = vcmp.eq.s32.totalorder %v2463_v42, 2 }
 0x448   :  { %v2494_v51 = vmul.f32 %v666_v15, %v648_v31 }
 0x44a   :  { %v682_v63 = vpack.c.bf16 %v2494_v51, %v2494_v51 }
 0x44b   :  { %v655_v54 = vpop.xlane.xlu0 %654 }
 0x44c   :  { %v667_v55 = vmax.f32 %v655_v54, 1e-24  ;;  %v685_v58 = vsel %vm300_vm5, %v682_v63, 0 }
 0x44d   :  { %697 = vmatpush.bf16.msrb.mxu0 %v685_v58  ;;  %733 = vmatpush.bf16.msra.mxu2 %v685_v58 }
 0x44e   :  { %2088 = vrsqrt.f32 %v667_v55  ;;  %vm674_vm9 = vweird.f32 %v667_v55 }
 0x450   :  { %1966 = vmatmul.msk.bf16.vlgmr.msrb.gmra.mxu0 %vm293_vm6, %v2336_v24  ;;  %1970 = vmatmul.msk.bf16.vlgmr.msra.gmra.mxu2 %vm293_vm6, %v2398_v2 }
 0x454   :  { %v2089_v60 = vpop.eup %2088 }
 0x455   :  { %v669_v62 = vmul.f32 %v2089_v60, %v667_v55  ;;  %vm675_vm8 = vweird.f32 %v2089_v60 }
 0x456   :  { %vm676_vm10 = vmor %vm674_vm9, %vm675_vm8  ;;  %vm1384_vm8 = vcmp.eq.s32.totalorder %v2463_v42, 3  ;;  %v2763_v42 = vld [vmem:[%s2958_s12] sm:$0xff] }
 0x457   :  { %v670_v59 = vmul.f32 %v2089_v60, %v669_v62 }
 0x459   :  { %v671_v0 = vmul.f32 0.5, %v670_v59 }
 0x45b   :  { %v672_v1 = vsub.f32 1.5, %v671_v0 }
 0x45d   :  { %v673_v53 = vmul.f32 %v2089_v60, %v672_v1 }
 0x45f   :  { %v677_v3 = vsel %vm676_vm10, %v2089_v60, %v673_v53 }
 0x460   :  { %1967 = vmatmul.msk.bf16.gmra.mxu0 %vm293_vm6, %v2366_v47  ;;  %1971 = vmatmul.msk.bf16.gmra.mxu2 %vm293_vm6, %v2409_v4  ;;  %v2507_v5 = vmul.f32 %v677_v3, %v649_v40 }
 0x462   :  { %v683_v61 = vpack.c.bf16 %v2507_v5, %v2507_v5 }
 0x464   :  { %v688_v17 = vsel %vm300_vm5, %v683_v61, 0 }
 0x465   :  { %715 = vmatpush.bf16.msrb.mxu1 %v688_v17  ;;  %751 = vmatpush.bf16.msra.mxu3 %v688_v17 }
 0x468   :  { %1968 = vmatmul.msk.bf16.vlgmr.msrb.gmra.mxu1 %vm293_vm6, %v2336_v24  ;;  %1972 = vmatmul.msk.bf16.vlgmr.msra.gmra.mxu3 %vm293_vm6, %v2398_v2 }
 0x478   :  { %1969 = vmatmul.msk.bf16.gmra.mxu1 %vm293_vm6, %v2366_v47  ;;  %1973 = vmatmul.msk.bf16.gmra.mxu3 %vm293_vm6, %v2409_v4 }
 0x4cd   :  { %v699_v18 = vpop.f32.mrf.mxu0 }
 0x4ce   :  { %v700_v22 = vadd.f32 %v699_v18, %v2423_v7 }
 0x4d3   :  { %v735_v20 = vpop.f32.mrf.mxu2 }
 0x4d4   :  { %v736_v23 = vadd.f32 %v735_v20, %v2421_v6 }
 0x4d5   :  { %v701_v25 = vpop.f32.mrf.mxu0 }
 0x4d6   :  { %v762_v26 = vmul.f32 %v736_v23, %v700_v22  ;;  %v702_v29 = vadd.f32 %v701_v25, %v2429_v11 }
 0x4d8   :  { %768 = vadd.xlane.f32.xlu1 %v762_v26 }
 0x4db   :  { %v737_v28 = vpop.f32.mrf.mxu2 }
 0x4dc   :  { %v738_v31 = vadd.f32 %v737_v28, %v2425_v9 }
 0x4dd   :  { %v704_v33 = vpop.f32.mrf.mxu0 }
 0x4de   :  { %v764_v36 = vmul.f32 %v738_v31, %v702_v29  ;;  %v705_v40 = vadd.f32 %v704_v33, %v2435_v16 }
 0x4e0   :  { %770 = vadd.xlane.f32.xlu2 %v764_v36 }
 0x4e3   :  { %v740_v39 = vpop.f32.mrf.mxu2 }
 0x4e4   :  { %v741_v44 = vadd.f32 %v740_v39, %v2431_v13 }
 0x4e5   :  { %v717_v45 = vpop.f32.mrf.mxu1  ;;  %v706_v35 = vpop.f32.mrf.mxu0 }
 0x4e6   :  { %v766_v30 = vmul.f32 %v741_v44, %v705_v40  ;;  %v718_v53 = vadd.f32 %v717_v45, %v2441_v27 }
 0x4e8   :  { %772 = vadd.xlane.f32.xlu2 %v766_v30 }
 0x4eb   :  { %v753_v46 = vpop.f32.mrf.mxu3  ;;  %v742_v21 = vpop.f32.mrf.mxu2 }
 0x4ec   :  { %v754_v0 = vadd.f32 %v753_v46, %v2427_v10 }
 0x4ed   :  { %v719_v48 = vpop.f32.mrf.mxu1 }
 0x4ee   :  { %v2527_v50 = vadd.f32 %v719_v48, %v2445_v34  ;;  %v763_v3 = vmul.f32 %v754_v0, %v718_v53 }
 0x4f3   :  { %v755_v49 = vpop.f32.mrf.mxu3 }
 0x4f4   :  { %v756_v15 = vadd.f32 %v755_v49, %v2433_v14 }
 0x4f5   :  { %v722_v63 = vpop.f32.mrf.mxu1 }
 0x4f6   :  { %v765_v54 = vmul.f32 %v756_v15, %v2527_v50  ;;  %v723_v58 = vadd.f32 %v722_v63, %v2449_v43 }
 0x4f8   :  { %782 = vadd.xlane.f32.xlu0 %v765_v54 }
 0x4fb   :  { %v758_v55 = vpop.f32.mrf.mxu3 }
 0x4fc   :  { %v759_v60 = vadd.f32 %v758_v55, %v2437_v19 }
 0x4fd   :  { %v724_v62 = vpop.f32.mrf.mxu1 }
 0x4fe   :  { %v767_v59 = vmul.f32 %v759_v60, %v723_v58 }
 0x500   :  { %784 = vadd.xlane.f32.xlu2 %v767_v59 }
 0x503   :  { %v760_v1 = vpop.f32.mrf.mxu3 }
 0x508   :  { %780 = vadd.xlane.f32.xlu2 %v763_v3 }
 0x54b   :  { %v769_v17 = vpop.xlane.xlu1 %768 }
 0x54c   :  { %v774_v25 = vmul.f32 1.442695, %v769_v17 }
 0x553   :  { %v771_v61 = vpop.xlane.xlu2 %770 }
 0x554   :  { %v776_v18 = vmul.f32 1.442695, %v771_v61 }
 0x55b   :  { %v773_v20 = vpop.xlane.xlu2 %772 }
 0x55c   :  { %v778_v23 = vmul.f32 1.442695, %v773_v20 }
 0x55e   :  { %2090 = vpow2.f32 %v778_v23 }
 0x55f   :  { %2092 = vpow2.f32 %v776_v18 }
 0x560   :  { %2094 = vpow2.f32 %v774_v25 }
 0x564   :  { %v2091_v26 = vpop.eup %2090 }
 0x565   :  { %v2093_v28 = vpop.eup %2092  ;;  %v802_v31 = vmul.f32 %v2091_v26, %v705_v40 }
 0x566   :  { %v2095_v33 = vpop.eup %2094  ;;  %v800_v39 = vmul.f32 %v2093_v28, %v702_v29  ;;  %v806_v29 = vsel %vm549_vm0, %v2091_v26, 0.0  ;;  %v805_v3 = vsel %vm549_vm0, %v2093_v28, 0.0 }
 0x567   :  { %v813_v36 = vpack.c.bf16 %v802_v31, %v802_v31  ;;  %v798_v45 = vmul.f32 %v2095_v33, %v700_v22  ;;  %v804_v1 = vsel %vm549_vm0, %v2095_v33, 0.0 }
 0x569   :  { %v817_v44 = vsel %vm300_vm5, %v813_v36, 0  ;;  %v810_v35 = vpack.c.bf16 %v800_v39, %v798_v45 }
 0x56a   :  { %831 = vmatpush.bf16.msra.mxu0 %v817_v44 }
 0x56b   :  { %v783_v21 = vpop.xlane.xlu0 %782 }
 0x56c   :  { %v788_v48 = vmul.f32 1.442695, %v783_v21 }
 0x56e   :  { %832 = vmatpush.bf16.msra.mxu0 %v810_v35 }
 0x571   :  { %1974 = vmatmul.msk.bf16.vlgmr.msra.gmra.mxu0 %vm581_vm2, %v2482_v8 }
 0x573   :  { %v785_v30 = vpop.xlane.xlu2 %784 }
 0x574   :  { %v790_v46 = vmul.f32 1.442695, %v785_v30 }
 0x576   :  { %2096 = vpow2.f32 %v790_v46 }
 0x577   :  { %2098 = vpow2.f32 %v788_v48 }
 0x57b   :  { %v781_v49 = vpop.xlane.xlu2 %780 }
 0x57c   :  { %v2097_v15 = vpop.eup %2096  ;;  %v786_v40 = vmul.f32 1.442695, %v781_v49 }
 0x57d   :  { %v809_v22 = vsel %vm553_vm1, %v2097_v15, %v806_v29  ;;  %v803_v63 = vmul.f32 %v2097_v15, %v723_v58  ;;  %v2099_v59 = vpop.eup %2098 }
 0x57e   :  { %2100 = vpow2.f32 %v786_v40  ;;  %v815_v54 = vpack.c.bf16 %v809_v22, %v809_v22  ;;  %v808_v61 = vsel %vm553_vm1, %v2099_v59, %v805_v3  ;;  %v801_v18 = vmul.f32 %v2099_v59, %v2527_v50 }
 0x57f   :  { %v814_v55 = vpack.c.bf16 %v803_v63, %v803_v63 }
 0x580   :  { %v823_v60 = vsel %vm300_vm5, %v815_v54, 0 }
 0x581   :  { %857 = vmatpush.bf16.msrb.mxu2 %v823_v60  ;;  %v820_v62 = vsel %vm300_vm5, %v814_v55, 0 }
 0x582   :  { %844 = vmatpush.bf16.msra.mxu1 %v820_v62 }
 0x584   :  { %v2101_v0 = vpop.eup %2100 }
 0x585   :  { %v807_v58 = vsel %vm553_vm1, %v2101_v0, %v804_v1  ;;  %v799_v17 = vmul.f32 %v2101_v0, %v718_v53 }
 0x586   :  { %v812_v20 = vpack.c.bf16 %v808_v61, %v807_v58 }
 0x587   :  { %v811_v23 = vpack.c.bf16 %v801_v18, %v799_v17 }
 0x588   :  { %858 = vmatpush.bf16.msrb.mxu2 %v812_v20 }
 0x589   :  { %845 = vmatpush.bf16.msra.mxu1 %v811_v23 }
 0x58b   :  { %1976 = vmatmul.msk.bf16.vlgmr.msrb.gmra.mxu2 %vm581_vm2, %v2482_v8 }
 0x58c   :  { %1975 = vmatmul.msk.bf16.vlgmr.msra.gmra.mxu1 %vm581_vm2, %v2482_v8 }
 0x5ee   :  { %v834_v25 = vpop.f32.mrf.mxu0 }
 0x5f6   :  { %v836_v26 = vpop.f32.mrf.mxu0 }
 0x609   :  { %v847_v28 = vpop.f32.mrf.mxu1 }
 0x60e   :  { %v860_v31 = vpop.f32.mrf.mxu2 }
 0x60f   :  { %v864_v33 = vadd.f32 1e-16, %v860_v31 }
 0x611   :  { %2102 = vrcp.f32 %v864_v33  ;;  %v849_v36 = vpop.f32.mrf.mxu1 }
 0x616   :  { %v862_v53 = vpop.f32.mrf.mxu2 }
 0x617   :  { %v2103_v39 = vpop.eup %2102 }
 0x618   :  { %872 = vperm.xlu0 %2046, %v2103_v39   ;;  %868 = vperm.xlu2 %2045, %v2103_v39  }
 0x672   :  { %v869_v50 = vpop.permute.xlu2 %868 }
 0x673   :  { %v877_v44 = vmul.f32 %v869_v50, %v834_v25 }
 0x675   :  { %v879_v45 = vadd.f32 %v877_v44, %v2494_v51 }
 0x677   :  { %v881_v35 = vmul.f32 %v879_v45, %v879_v45 }
 0x679   :  { %882 = vadd.xlane.f32.xlu0 %v881_v35 }
 0x68a   :  { %v873_v30 = vpop.permute.xlu0 %872 }
 0x68b   :  { %v878_v46 = vmul.f32 %v873_v30, %v847_v28 }
 0x68d   :  { %v880_v21 = vadd.f32 %v878_v46, %v2507_v5 }
 0x68f   :  { %v884_v48 = vmul.f32 %v880_v21, %v880_v21 }
 0x691   :  { %885 = vadd.xlane.f32.xlu2 %v884_v48 }
 0x6ec   :  { %v883_v49 = vpop.xlane.xlu0 %882 }
 0x6ed   :  { %v887_v15 = vmax.f32 %v883_v49, 1e-24 }
 0x6ef   :  { %2104 = vrsqrt.f32 %v887_v15  ;;  %vm894_vm12 = vweird.f32 %v887_v15 }
 0x6f5   :  { %v2105_v40 = vpop.eup %2104 }
 0x6f6   :  { %v889_v29 = vmul.f32 %v2105_v40, %v887_v15  ;;  %vm895_vm11 = vweird.f32 %v2105_v40 }
 0x6f7   :  { %vm896_vm13 = vmor %vm894_vm12, %vm895_vm11 }
 0x6f8   :  { %v890_v22 = vmul.f32 %v2105_v40, %v889_v29 }
 0x6fa   :  { %v891_v63 = vmul.f32 0.5, %v890_v22 }
 0x6fc   :  { %v892_v54 = vsub.f32 1.5, %v891_v63 }
 0x6fe   :  { %v893_v55 = vmul.f32 %v2105_v40, %v892_v54 }
 0x700   :  { %v897_v51 = vsel %vm896_vm13, %v2105_v40, %v893_v55 }
 0x701   :  { %v2559_v60 = vmul.f32 %v897_v51, %v879_v45 }
 0x703   :  { %v913_v5 = vpack.c.bf16 %v2559_v60, %v2559_v60 }
 0x704   :  { %v886_v62 = vpop.xlane.xlu2 %885 }
 0x705   :  { %v898_v59 = vmax.f32 %v886_v62, 1e-24  ;;  %v916_v0 = vsel %vm300_vm5, %v913_v5, 0 }
 0x706   :  { %928 = vmatpush.bf16.msrb.mxu3 %v916_v0  ;;  %964 = vmatpush.bf16.msrb.mxu1 %v916_v0 }
 0x707   :  { %2106 = vrsqrt.f32 %v898_v59  ;;  %vm905_vm15 = vweird.f32 %v898_v59 }
 0x709   :  { %1977 = vmatmul.msk.bf16.vlgmr.msrb.gmra.mxu3 %vm293_vm6, %v2336_v24  ;;  %1981 = vmatmul.msk.bf16.vlgmr.msrb.gmra.mxu1 %vm293_vm6, %v2398_v2 }
 0x70d   :  { %v2107_v1 = vpop.eup %2106 }
 0x70e   :  { %v900_v3 = vmul.f32 %v2107_v1, %v898_v59  ;;  %vm906_vm14 = vweird.f32 %v2107_v1 }
 0x70f   :  { %vm907_vm3 = vmor %vm905_vm15, %vm906_vm14 }
 0x710   :  { %v901_v58 = vmul.f32 %v2107_v1, %v900_v3 }
 0x712   :  { %v902_v61 = vmul.f32 0.5, %v901_v58 }
 0x714   :  { %v903_v17 = vsub.f32 1.5, %v902_v61 }
 0x716   :  { %v904_v18 = vmul.f32 %v2107_v1, %v903_v17 }
 0x718   :  { %v908_v20 = vsel %vm907_vm3, %v2107_v1, %v904_v18 }
 0x719   :  { %1978 = vmatmul.msk.bf16.gmra.mxu3 %vm293_vm6, %v2366_v47  ;;  %1982 = vmatmul.msk.bf16.gmra.mxu1 %vm293_vm6, %v2409_v4  ;;  %v2572_v23 = vmul.f32 %v908_v20, %v880_v21 }
 0x71b   :  { %v914_v25 = vpack.c.bf16 %v2572_v23, %v2572_v23 }
 0x71d   :  { %v919_v26 = vsel %vm300_vm5, %v914_v25, 0 }
 0x71e   :  { %946 = vmatpush.bf16.msrb.mxu0 %v919_v26  ;;  %982 = vmatpush.bf16.msra.mxu2 %v919_v26 }
 0x721   :  { %1979 = vmatmul.msk.bf16.vlgmr.msrb.gmra.mxu0 %vm293_vm6, %v2336_v24  ;;  %1983 = vmatmul.msk.bf16.vlgmr.msra.gmra.mxu2 %vm293_vm6, %v2398_v2 }
 0x731   :  { %1980 = vmatmul.msk.bf16.gmra.mxu0 %vm293_vm6, %v2366_v47  ;;  %1984 = vmatmul.msk.bf16.gmra.mxu2 %vm293_vm6, %v2409_v4 }
 0x786   :  { %v966_v28 = vpop.f32.mrf.mxu1 }
 0x787   :  { %v2586_v33 = vadd.f32 %v966_v28, %v2421_v6 }
 0x78c   :  { %v930_v31 = vpop.f32.mrf.mxu3 }
 0x78d   :  { %v2589_v36 = vadd.f32 %v930_v31, %v2423_v7 }
 0x78e   :  { %v968_v53 = vpop.f32.mrf.mxu1 }
 0x78f   :  { %v993_v39 = vmul.f32 %v2586_v33, %v2589_v36  ;;  %v969_v49 = vadd.f32 %v968_v53, %v2425_v9 }
 0x791   :  { %999 = vadd.xlane.f32.xlu2 %v993_v39 }
 0x794   :  { %v932_v2 = vpop.f32.mrf.mxu3 }
 0x795   :  { %v933_v6 = vadd.f32 %v932_v2, %v2429_v11 }
 0x796   :  { %v971_v50 = vpop.f32.mrf.mxu1 }
 0x797   :  { %v972_v45 = vadd.f32 %v971_v50, %v2431_v13  ;;  %v995_v13 = vmul.f32 %v969_v49, %v933_v6 }
 0x79c   :  { %v935_v44 = vpop.f32.mrf.mxu3 }
 0x79d   :  { %v936_v35 = vadd.f32 %v935_v44, %v2435_v16 }
 0x79e   :  { %v948_v30 = vpop.f32.mrf.mxu0  ;;  %v973_v46 = vpop.f32.mrf.mxu1 }
 0x79f   :  { %v997_v21 = vmul.f32 %v972_v45, %v936_v35  ;;  %v2598_v15 = vadd.f32 %v948_v30, %v2441_v27 }
 0x7a1   :  { %1003 = vadd.xlane.f32.xlu0 %v997_v21 }
 0x7a4   :  { %v984_v7 = vpop.f32.mrf.mxu2  ;;  %v937_v48 = vpop.f32.mrf.mxu3 }
 0x7a5   :  { %v2601_v40 = vadd.f32 %v984_v7, %v2427_v10 }
 0x7a6   :  { %v950_v29 = vpop.f32.mrf.mxu0 }
 0x7a7   :  { %v994_v16 = vmul.f32 %v2601_v40, %v2598_v15  ;;  %v2606_v11 = vadd.f32 %v950_v29, %v2445_v34 }
 0x7a9   :  { %1001 = vadd.xlane.f32.xlu0 %v995_v13  ;;  %1011 = vadd.xlane.f32.xlu2 %v994_v16 }
 0x7ac   :  { %v986_v22 = vpop.f32.mrf.mxu2 }
 0x7ad   :  { %v2609_v63 = vadd.f32 %v986_v22, %v2433_v14 }
 0x7ae   :  { %v953_v9 = vpop.f32.mrf.mxu0 }
 0x7af   :  { %v996_v27 = vmul.f32 %v2609_v63, %v2606_v11  ;;  %v954_v54 = vadd.f32 %v953_v9, %v2449_v43 }
 0x7b1   :  { %1013 = vadd.xlane.f32.xlu0 %v996_v27 }
 0x7b4   :  { %v989_v10 = vpop.f32.mrf.mxu2 }
 0x7b5   :  { %v990_v55 = vadd.f32 %v989_v10, %v2437_v19 }
 0x7b6   :  { %v955_v51 = vpop.f32.mrf.mxu0 }
 0x7b7   :  { %v998_v5 = vmul.f32 %v990_v55, %v954_v54 }
 0x7b9   :  { %1015 = vadd.xlane.f32.xlu1 %v998_v5 }
 0x7bc   :  { %v991_v62 = vpop.f32.mrf.mxu2 }
 0x7d2   :  { %1188 = vxpose.xlu2.c.b16.start [1/2] (short) (narrow) %v2348_v37, 16 }
 0x7da   :  { %1248 = vxpose.xlu0.c.b16.start [1/2] (short) (narrow) %v2353_v38, 16 }
 0x7e2   :  { %1189 = vxpose.xlu2.c.b16.end [2/2] (short) (narrow) %v2379_v56, 16 }
 0x7ea   :  { %1249 = vxpose.xlu0.c.b16.end [2/2] (short) (narrow) %v2381_v57, 16 }
 0x7f3   :  { %1059 = vxpose.xlu1.c.b16.start [1/2] (short) (narrow) %v2336_v24, 16 }
 0x803   :  { %1060 = vxpose.xlu1.c.b16.end [2/2] (short) (narrow) %v2366_v47, 16 }
 0x804   :  { %v1000_v43 = vpop.xlane.xlu2 %999 }
 0x805   :  { %v1005_v19 = vmul.f32 1.442695, %v1000_v43 }
 0x814   :  { %v1004_v14 = vpop.xlane.xlu0 %1003 }
 0x815   :  { %v1009_v34 = vmul.f32 1.442695, %v1004_v14 }
 0x817   :  { %2108 = vpow2.f32 %v1009_v34  ;;  %v1369_v34 = vld [vmem:[%s2955_s9] sm:$0xff] }
 0x818   :  { %2110 = vpow2.f32 %v1005_v19 }
 0x81c   :  { %v1002_v59 = vpop.xlane.xlu0 %1001  ;;  %v1012_v2 = vpop.xlane.xlu2 %1011 }
 0x81d   :  { %v2621_v0 = vpop.eup %2108  ;;  %v1007_v37 = vmul.f32 1.442695, %v1002_v59 }
 0x81e   :  { %v1051_v38 = vmul.f32 %v2621_v0, %v972_v45  ;;  %v1033_v1 = vmul.f32 %v2621_v0, %v936_v35  ;;  %v2629_v17 = vpop.eup %2110  ;;  %v1037_v35 = vsel %vm549_vm0, %v2621_v0, 0.0 }
 0x81f   :  { %2112 = vpow2.f32 %v1007_v37  ;;  %v1047_v20 = vmul.f32 %v2629_v17, %v2586_v33  ;;  %v1029_v26 = vmul.f32 %v2629_v17, %v2589_v36  ;;  %v1017_v33 = vmul.f32 1.442695, %v1012_v2 }
 0x820   :  { %v1055_v3 = vpack.c.bf16 %v1051_v38, %v1051_v38  ;;  %v1044_v58 = vpack.c.bf16 %v1033_v1, %v1033_v1 }
 0x822   :  { %v1079_v24 = vsel %vm300_vm5, %v1055_v3, 0  ;;  %v2627_v61 = vsel %vm300_vm5, %v1044_v58, 0 }
 0x823   :  { %1093 = vmatpush.bf16.msra.mxu3 %v1079_v24  ;;  %1138 = vmatpush.bf16.msrb.mxu2 %v2627_v61 }
 0x824   :  { %v1014_v39 = vpop.xlane.xlu0 %1013 }
 0x825   :  { %v2632_v18 = vpop.eup %2112  ;;  %v1019_v50 = vmul.f32 1.442695, %v1014_v39 }
 0x826   :  { %v1049_v25 = vmul.f32 %v2632_v18, %v969_v49  ;;  %v1031_v28 = vmul.f32 %v2632_v18, %v933_v6  ;;  %v1036_v13 = vsel %vm549_vm0, %v2632_v18, 0.0 }
 0x828   :  { %v1053_v31 = vpack.c.bf16 %v1049_v25, %v1047_v20  ;;  %v2640_v53 = vpack.c.bf16 %v1031_v28, %v1029_v26 }
 0x82a   :  { %1094 = vmatpush.bf16.msra.mxu3 %v1053_v31  ;;  %1139 = vmatpush.bf16.msrb.mxu2 %v2640_v53 }
 0x82c   :  { %v1016_v44 = vpop.xlane.xlu1 %1015 }
 0x82d   :  { %v1021_v45 = vmul.f32 1.442695, %v1016_v44  ;;  %1988 = vmatmul.msk.bf16.vlgmr.msrb.gmra.mxu2 %vm581_vm2, %v2482_v8 }
 0x82f   :  { %2114 = vpow2.f32 %v1021_v45 }
 0x830   :  { %2116 = vpow2.f32 %v1019_v50 }
 0x831   :  { %2118 = vpow2.f32 %v1017_v33 }
 0x835   :  { %v2645_v36 = vpop.eup %2114 }
 0x836   :  { %v2650_v30 = vpop.eup %2116  ;;  %v1040_v46 = vsel %vm553_vm1, %v2645_v36, %v1037_v35  ;;  %v1052_v21 = vmul.f32 %v2645_v36, %v990_v55  ;;  %v1034_v6 = vmul.f32 %v2645_v36, %v954_v54  ;;  %v1035_v55 = vsel %vm549_vm0, %v2629_v17, 0.0 }
 0x837   :  { %v1046_v7 = vpack.c.bf16 %v1040_v46, %v1040_v46  ;;  %v2657_v48 = vpop.eup %2118  ;;  %v1039_v22 = vsel %vm553_vm1, %v2650_v30, %v1036_v13  ;;  %v1050_v9 = vmul.f32 %v2650_v30, %v2609_v63  ;;  %v1032_v27 = vmul.f32 %v2650_v30, %v2606_v11 }
 0x838   :  { %v1056_v49 = vpack.c.bf16 %v1052_v21, %v1052_v21  ;;  %v1045_v29 = vpack.c.bf16 %v1034_v6, %v1034_v6  ;;  %v1038_v51 = vsel %vm553_vm1, %v2657_v48, %v1035_v55  ;;  %v1048_v63 = vmul.f32 %v2657_v48, %v2601_v40 }
 0x839   :  { %v1085_v16 = vsel %vm300_vm5, %v1046_v7, 0  ;;  %v1030_v11 = vmul.f32 %v2657_v48, %v2598_v15  ;;  %v1043_v5 = vpack.c.bf16 %v1039_v22, %v1038_v51  ;;  %v1370_v15 = vld [vmem:[%s2955_s9 + $0x8] sm:$0xff] }
 0x83a   :  { %1119 = vmatpush.bf16.msra.mxu1 %v1085_v16  ;;  %v1082_v10 = vsel %vm300_vm5, %v1056_v49, 0  ;;  %v1130_v54 = vsel %vm300_vm5, %v1045_v29, 0  ;;  %v1054_v62 = vpack.c.bf16 %v1050_v9, %v1048_v63  ;;  %v2047_v40 = vpack.i.bf16 %v1370_v15, %v1369_v34 }
 0x83b   :  { %1106 = vmatpush.bf16.msra.mxu0 %v1082_v10  ;;  %1151 = vmatpush.bf16.msrb.mxu3 %v1130_v54  ;;  %v1042_v14 = vpack.c.bf16 %v1032_v27, %v1030_v11 }
 0x83c   :  { %1226 = vmatpush.bf16.msra.mxu2 %v1082_v10 }
 0x83e   :  { %1120 = vmatpush.bf16.msra.mxu1 %v1043_v5 }
 0x83f   :  { %1107 = vmatpush.bf16.msra.mxu0 %v1054_v62  ;;  %1152 = vmatpush.bf16.msrb.mxu3 %v1042_v14 }
 0x840   :  { %1227 = vmatpush.bf16.msra.mxu2 %v1054_v62 }
 0x842   :  { %1213 = vmatpush.bf16.msrb.mxu1 %v1079_v24 }
 0x843   :  { %1164 = vmatpush.bf16.msrb.mxu0 %v1085_v16 }
 0x844   :  { %1299 = vmatpush.bf16.msrb.mxu2 %v1085_v16 }
 0x846   :  { %1214 = vmatpush.bf16.msrb.mxu1 %v1053_v31 }
 0x847   :  { %1165 = vmatpush.bf16.msrb.mxu0 %v1043_v5 }
 0x848   :  { %1300 = vmatpush.bf16.msrb.mxu2 %v1043_v5 }
 0x84b   :  { %2048 = vperm.xlu2 %2045, %v2047_v40  }
 0x853   :  { %2058 = vset.pattern.permute.xlu2 %v2214_v12 }
 0x856   :  { %2057 = vset.pattern.permute.xlu1 %v2215_v52 }
 0x858   :  { %2053 = vperm.xlu0 %2046, %v2047_v40  }
 0x873   :  { %v2690_v43 = vpop.trf.xlu2 }
 0x874   :  { %1992 = vmatmul.msk.bf16.vlgmr.msra.gmra.mxu2 %vm581_vm2, %v2690_v43 }
 0x886   :  { %v2694_v19 = vpop.trf.xlu0 }
 0x887   :  { %1996 = vmatmul.msk.bf16.vlgmr.msrb.gmra.mxu2 %vm581_vm2, %v2694_v19 }
 0x89f   :  { %v2698_v59 = vpop.trf.xlu1 }
 0x8a0   :  { %1985 = vmatmul.msk.bf16.vlgmr.msra.gmra.mxu3 %vm581_vm2, %v2698_v59  ;;  %1986 = vmatmul.msk.bf16.vlgmr.msra.gmra.mxu0 %vm581_vm2, %v2698_v59 }
 0x8a1   :  { %1987 = vmatmul.msk.bf16.vlgmr.msra.gmra.mxu1 %vm581_vm2, %v2698_v59  ;;  %1239 = vmatpush.bf16.msra.mxu3 %v1085_v16 }
 0x8a2   :  { %1273 = vmatpush.bf16.msra.mxu0 %v2627_v61  ;;  %1286 = vmatpush.bf16.msra.mxu1 %v1130_v54 }
 0x8a5   :  { %1240 = vmatpush.bf16.msra.mxu3 %v1043_v5  ;;  %v2049_v10 = vpop.permute.xlu2 %2048 }
 0x8a6   :  { %1274 = vmatpush.bf16.msra.mxu0 %v2640_v53  ;;  %1287 = vmatpush.bf16.msra.mxu1 %v1042_v14  ;;  %v2050_v62 = vunpack.i.l.bf16 %v2049_v10 }
 0x8a8   :  { %v1376_v15 = vsel %vm549_vm0, %v2050_v62, 0.0 }
 0x8b0   :  { %v1141_v12 = vpop.f32.mrf.mxu2  ;;  %1989 = vmatmul.msk.bf16.vlgmr.msrb.gmra.mxu3 %vm581_vm2, %v2482_v8  ;;  %1990 = vmatmul.msk.bf16.vlgmr.msrb.gmra.mxu0 %vm581_vm2, %v2482_v8 }
 0x8b1   :  { %1991 = vmatmul.msk.bf16.vlgmr.msrb.gmra.mxu1 %vm581_vm2, %v2690_v43 }
 0x8b8   :  { %v1143_v52 = vpop.f32.mrf.mxu2 }
 0x8c0   :  { %1993 = vmatmul.msk.bf16.vlgmr.msra.gmra.mxu3 %vm581_vm2, %v2690_v43  ;;  %1994 = vmatmul.msk.bf16.vlgmr.msra.gmra.mxu0 %vm581_vm2, %v2694_v19 }
 0x8c1   :  { %1995 = vmatmul.msk.bf16.vlgmr.msra.gmra.mxu1 %vm581_vm2, %v2694_v19 }
 0x8ca   :  { %v2054_v5 = vpop.permute.xlu0 %2053 }
 0x8cb   :  { %v2055_v14 = vunpack.i.l.bf16 %v2054_v5 }
 0x8f7   :  { %v1229_v37 = vpop.f32.mrf.mxu2 }
 0x8ff   :  { %v1231_v38 = vpop.f32.mrf.mxu2 }
 0x900   :  { %v1381_v38 = vsel %vm553_vm1, %v2055_v14, %v1376_v15 }
 0x90a   :  { %v1302_v1 = vpop.f32.mrf.mxu2 }
 0x912   :  { %v1304_v61 = vpop.f32.mrf.mxu2 }
 0x91d   :  { %v1109_v3 = vpop.f32.mrf.mxu0 }
 0x91e   :  { %v1122_v58 = vpop.f32.mrf.mxu1 }
 0x923   :  { %v1096_v24 = vpop.f32.mrf.mxu3 }
 0x924   :  { %v1142_v40 = vadd.f32 %v1141_v12, %v1096_v24 }
 0x925   :  { %v1111_v20 = vpop.f32.mrf.mxu0 }
 0x926   :  { %v1124_v25 = vpop.f32.mrf.mxu1 }
 0x92b   :  { %v1098_v26 = vpop.f32.mrf.mxu3 }
 0x92d   :  { %v1167_v28 = vpop.f32.mrf.mxu0 }
 0x92e   :  { %v1168_v31 = vadd.f32 %v1167_v28, %v1122_v58  ;;  %v1216_v53 = vpop.f32.mrf.mxu1 }
 0x930   :  { %v1171_v39 = vadd.f32 1e-16, %v1168_v31  ;;  %v2737_v31 = vld [vmem:[%s2956_s10] sm:$0xff] }
 0x932   :  { %2120 = vrcp.f32 %v1171_v39  ;;  %v2056_v39 = vunpack.i.h.bf16 %v2054_v5 }
 0x933   :  { %v1154_v2 = vpop.f32.mrf.mxu3 }
 0x934   :  { %v1155_v50 = vadd.f32 %v1154_v2, %v1109_v3 }
 0x935   :  { %v1169_v44 = vpop.f32.mrf.mxu0 }
 0x936   :  { %v1218_v45 = vpop.f32.mrf.mxu1 }
 0x938   :  { %v2121_v33 = vpop.eup %2120 }
 0x939   :  { %1179 = vperm.xlu2 %2058, %v2121_v33   ;;  %1175 = vperm.xlu1 %2057, %v2121_v33  }
 0x93b   :  { %v1156_v35 = vpop.f32.mrf.mxu3 }
 0x93d   :  { %v1276_v46 = vpop.f32.mrf.mxu0 }
 0x93e   :  { %v1277_v21 = vadd.f32 %v1276_v46, %v1216_v53  ;;  %v1289_v6 = vpop.f32.mrf.mxu1  ;;  %v2051_v53 = vunpack.i.h.bf16 %v2049_v10  ;;  %v2792_v10 = vld [vmem:[%s2954_s8] sm:$0xff] }
 0x93f   :  { %v1290_v7 = vadd.f32 %v1289_v6, %v1229_v37 }
 0x943   :  { %v1242_v49 = vpop.f32.mrf.mxu3 }
 0x944   :  { %v1303_v29 = vadd.f32 %v1302_v1, %v1242_v49 }
 0x945   :  { %v1278_v13 = vpop.f32.mrf.mxu0 }
 0x946   :  { %v1306_v16 = vadd.f32 1e-16, %v1303_v29  ;;  %v1291_v22 = vpop.f32.mrf.mxu1  ;;  %v2783_v29 = vld [vmem:[%s2954_s8 + $0x8] sm:$0xff]  ;;  %s2217_s8 = smov 127  }
 0x947   :  { %v1340_v13 = vmul.f32 %v2783_v29, %v2783_v29 }
 0x948   :  { %2122 = vrcp.f32 %v1306_v16 }
 0x94b   :  { %v1244_v9 = vpop.f32.mrf.mxu3 }
 0x94e   :  { %v2123_v27 = vpop.eup %2122 }
 0x94f   :  { %1314 = vperm.xlu2 %2058, %v2123_v27   ;;  %1310 = vperm.xlu1 %2057, %v2123_v27  }
 0x979   :  { %1343 = vadd.xlane.f32.xlu1 %v1340_v13 }
 0x993   :  { %v1180_v54 = vpop.permute.xlu2 %1179 }
 0x994   :  { %v1185_v55 = vmul.f32 %v1180_v54, %v1155_v50 }
 0x996   :  { %vm1322_vm4 = vcmp.ge.f32.partialorder %v1185_v55, 0.0  ;;  %v1324_v51 = vmul.f32 0.01, %v1185_v55 }
 0x998   :  { %v1326_v63 = vsel %vm1322_vm4, %v1185_v55, %v1324_v51 }
 0x999   :  { %v1328_v11 = vadd.f32 %v1326_v63, %v2572_v23 }
 0x99b   :  { %1908 = vst [vmem:[#allocation7 + $0x10] sm:$0xff] %v1328_v11 }
 0x9a9   :  { %v1315_v34 = vpop.permute.xlu2 %1314 }
 0x9aa   :  { %v1320_v52 = vmul.f32 %v1315_v34, %v1290_v7 }
 0x9ab   :  { %v1176_v37 = vpop.permute.xlu1 %1175 }
 0x9ac   :  { %vm1330_vm9 = vcmp.ge.f32.partialorder %v1320_v52, 0.0  ;;  %v1332_v23 = vmul.f32 0.01, %v1320_v52  ;;  %v1184_v1 = vmul.f32 %v1176_v37, %v1142_v40  ;;  %v1383_v3 = vsel %vm1382_vm7, %v1176_v37, %v1381_v38 }
 0x9ad   :  { %v1385_v58 = vsel %vm1384_vm8, %v1180_v54, %v1383_v3  ;;  %v1339_v54 = vmul.f32 %v2792_v10, %v2792_v10 }
 0x9ae   :  { %v1334_v61 = vsel %vm1330_vm9, %v1320_v52, %v1332_v23  ;;  %vm1321_vm10 = vcmp.ge.f32.partialorder %v1184_v1, 0.0  ;;  %v1323_v20 = vmul.f32 0.01, %v1184_v1  ;;  %v1387_v12 = vpack.c.bf16 %v1385_v58, %v1385_v58 }
 0x9af   :  { %v1336_v24 = vadd.f32 %v1334_v61, %v2359_v41  ;;  %v1393_v41 = vsel %vm549_vm0, %v2051_v53, 0.0  ;;  %1341 = vadd.xlane.f32.xlu0 %v1339_v54 }
 0x9b0   :  { %v1325_v25 = vsel %vm1321_vm10, %v1184_v1, %v1323_v20  ;;  %v1449_v26 = vsel %vm300_vm5, %v1387_v12, 0 }
 0x9b1   :  { %1910 = vst [vmem:[#allocation7 + $0x28] sm:$0xff] %v1336_v24  ;;  %v1327_v28 = vadd.f32 %v1325_v25, %v2559_v60  ;;  %1476 = vmatpush.bf16.msra.mxu2 %v1449_v26  ;;  %v1398_v60 = vsel %vm553_vm1, %v2056_v39, %v1393_v41 }
 0x9b3   :  { %1907 = vst [vmem:[#allocation7 + $0x8] sm:$0xff] %v1327_v28 }
 0x9b4   :  { %2003 = vmatmul.msk.bf16.vlgmr.msra.gmra.mxu2 %vm293_vm6, %v2737_v31 }
 0x9b5   :  { %1548 = vmatpush.bf16.msrb.mxu2 %v1449_v26 }
 0x9c1   :  { %v1311_v2 = vpop.permute.xlu1 %1310 }
 0x9c2   :  { %v1319_v50 = vmul.f32 %v1311_v2, %v1277_v21  ;;  %v1399_v44 = vsel %vm1382_vm7, %v1311_v2, %v1398_v60  ;;  %v2756_v21 = vld [vmem:[%s2957_s11] sm:$0xff] }
 0x9c3   :  { %v1400_v45 = vsel %vm1384_vm8, %v1315_v34, %v1399_v44 }
 0x9c4   :  { %vm1329_vm11 = vcmp.ge.f32.partialorder %v1319_v50, 0.0  ;;  %v1331_v33 = vmul.f32 0.01, %v1319_v50  ;;  %v1402_v35 = vpack.c.bf16 %v1400_v45, %v1400_v45  ;;  %2004 = vmatmul.msk.bf16.gmra.mxu2 %vm293_vm6, %v2366_v47 }
 0x9c6   :  { %v1333_v46 = vsel %vm1329_vm11, %v1319_v50, %v1331_v33  ;;  %v1407_v6 = vsel %vm300_vm5, %v1402_v35, 0 }
 0x9c7   :  { %v1335_v7 = vadd.f32 %v1333_v46, %v2340_v32  ;;  %1434 = vmatpush.bf16.msrb.mxu0 %v1407_v6  ;;  %v2774_v32 = vld [vmem:[%s2959_s13] sm:$0xff] }
 0x9c9   :  { %1909 = vst [vmem:[#allocation7 + $0x20] sm:$0xff] %v1335_v7 }
 0x9ca   :  { %1999 = vmatmul.msk.bf16.vlgmr.msrb.gmra.mxu0 %vm293_vm6, %v2756_v21 }
 0x9cb   :  { %1512 = vmatpush.bf16.msra.mxu0 %v1407_v6 }
 0x9d4   :  { %2011 = vmatmul.msk.bf16.vlgmr.msrb.gmra.mxu2 %vm293_vm6, %v2763_v42 }
 0x9da   :  { %2000 = vmatmul.msk.bf16.gmra.mxu0 %vm293_vm6, %v2379_v56 }
 0x9e4   :  { %2012 = vmatmul.msk.bf16.gmra.mxu2 %vm293_vm6, %v2409_v4 }
 0x9ea   :  { %2007 = vmatmul.msk.bf16.vlgmr.msra.gmra.mxu0 %vm293_vm6, %v2774_v32 }
 0x9ec   :  { %v1344_v39 = vpop.xlane.xlu1 %1343 }
 0x9ed   :  { %v1346_v41 = vmax.f32 %v1344_v39, 1e-24 }
 0x9ef   :  { %2124 = vrsqrt.f32 %v1346_v41  ;;  %vm1363_vm0 = vweird.f32 %v1346_v41 }
 0x9f5   :  { %v2125_v33 = vpop.eup %2124 }
 0x9f6   :  { %v1358_v35 = vmul.f32 %v2125_v33, %v1346_v41  ;;  %vm1364_vm1 = vweird.f32 %v2125_v33 }
 0x9f7   :  { %vm1365_vm12 = vmor %vm1363_vm0, %vm1364_vm1 }
 0x9f8   :  { %v1359_v46 = vmul.f32 %v2125_v33, %v1358_v35 }
 0x9fa   :  { %2008 = vmatmul.msk.bf16.gmra.mxu0 %vm293_vm6, %v2381_v57  ;;  %v1360_v6 = vmul.f32 0.5, %v1359_v46 }
 0x9fc   :  { %v1361_v7 = vsub.f32 1.5, %v1360_v6 }
 0xa37   :  { %v1478_v49 = vpop.f32.mrf.mxu2 }
 0xa3f   :  { %v1480_v16 = vpop.f32.mrf.mxu2 }
 0xa47   :  { %v1436_v22 = vpop.f32.mrf.mxu0  ;;  %v1483_v9 = vpop.f32.mrf.mxu2 }
 0xa48   :  { %v2787_v27 = vadd.f32 %v1478_v49, %v1436_v22  ;;  %v1342_v49 = vpop.xlane.xlu0 %1341 }
 0xa49   :  { %v1345_v13 = vmax.f32 %v1342_v49, 1e-24 }
 0xa4a   :  { %1565 = vrot.lane.b32.xlu2 %v2787_v27, %s2216_s7 }
 0xa4b   :  { %2126 = vrsqrt.f32 %v1345_v13  ;;  %vm1353_vm13 = vweird.f32 %v1345_v13 }
 0xa4f   :  { %v1438_v55 = vpop.f32.mrf.mxu0  ;;  %v1485_v51 = vpop.f32.mrf.mxu2 }
 0xa50   :  { %v2797_v63 = vadd.f32 %v1480_v16, %v1438_v55  ;;  %v1362_v16 = vmul.f32 %v2125_v33, %v1361_v7 }
 0xa51   :  { %v2127_v55 = vpop.eup %2126 }
 0xa52   :  { %1567 = vrot.lane.b32.xlu2 %v2797_v63, %s2216_s7  ;;  %v1366_v22 = vsel %vm1365_vm12, %v2125_v33, %v1362_v16  ;;  %vm1354_vm14 = vweird.f32 %v2127_v55 }
 0xa53   :  { %vm1355_vm15 = vmor %vm1353_vm13, %vm1354_vm14 }
 0xa57   :  { %v1441_v11 = vpop.f32.mrf.mxu0  ;;  %v1550_v5 = vpop.f32.mrf.mxu2 }
 0xa58   :  { %v2800_v62 = vadd.f32 %v1483_v9, %v1441_v11  ;;  %v2821_v9 = vmul.f32 %v1366_v22, %v2783_v29  ;;  %v1348_v11 = vmul.f32 %v2127_v55, %v1345_v13  ;;  %v1602_v13 = vmul.f32 %v2632_v18, %v2797_v63 }
 0xa5a   :  { %1569 = vrot.lane.b32.xlu2 %v2800_v62, %s2216_s7  ;;  %v1401_v54 = vpack.c.bf16 %v2821_v9, %v2821_v9 }
 0xa5c   :  { %v1404_v51 = vsel %vm300_vm5, %v1401_v54, 0 }
 0xa5d   :  { %1416 = vmatpush.bf16.msrb.mxu3 %v1404_v51 }
 0xa5f   :  { %v1443_v14 = vpop.f32.mrf.mxu0  ;;  %v1552_v34 = vpop.f32.mrf.mxu2 }
 0xa60   :  { %1997 = vmatmul.msk.bf16.vlgmr.msrb.gmra.mxu3 %vm293_vm6, %v2756_v21 }
 0xa61   :  { %1494 = vmatpush.bf16.msra.mxu3 %v1404_v51 }
 0xa67   :  { %v1514_v15 = vpop.f32.mrf.mxu0  ;;  %v1555_v40 = vpop.f32.mrf.mxu2 }
 0xa68   :  { %v1551_v58 = vadd.f32 %v1550_v5, %v1514_v15  ;;  %v1349_v5 = vmul.f32 %v2127_v55, %v1348_v11 }
 0xa6a   :  { %v1559_v61 = vmul.f32 %v2629_v17, %v1551_v58  ;;  %v1577_v20 = vmul.f32 %v2657_v48, %v1551_v58  ;;  %v1350_v14 = vmul.f32 0.5, %v1349_v5 }
 0xa6f   :  { %v1516_v52 = vpop.f32.mrf.mxu0  ;;  %v1557_v37 = vpop.f32.mrf.mxu2 }
 0xa70   :  { %v2803_v38 = vadd.f32 %v1552_v34, %v1516_v52  ;;  %v1351_v34 = vsub.f32 1.5, %v1350_v14  ;;  %v1621_v52 = vmul.f32 %v2645_v36, %v2800_v62  ;;  %1998 = vmatmul.msk.bf16.gmra.mxu3 %vm293_vm6, %v2379_v56 }
 0xa72   :  { %1609 = vrot.lane.b32.xlu1 %v2803_v38, %s2216_s7  ;;  %v1560_v26 = vmul.f32 %v2632_v18, %v2803_v38  ;;  %v1352_v29 = vmul.f32 %v2127_v55, %v1351_v34 }
 0xa74   :  { %v1356_v15 = vsel %vm1355_vm15, %v2127_v55, %v1352_v29 }
 0xa75   :  { %v2833_v37 = vmul.f32 %v1356_v15, %v2792_v10  ;;  %v1619_v10 = vmul.f32 %v2657_v48, %v2787_v27  ;;  %v2218_v48 = vmov 2  }
 0xa76   :  { %2061 = vset.pattern.permute.xlu1 %v2218_v48  ;;  %2059 = vset.pattern.permute.xlu2 %v2218_v48 }
 0xa77   :  { %v1519_v23 = vpop.f32.mrf.mxu0  ;;  %2060 = vset.pattern.permute.xlu0 %v2218_v48 }
 0xa78   :  { %v1556_v1 = vadd.f32 %v1555_v40, %v1519_v23  ;;  %v1603_v40 = vmul.f32 %v2621_v0, %v2800_v62 }
 0xa7a   :  { %1611 = vrot.lane.b32.xlu2 %v1556_v1, %s2216_s7  ;;  %v1561_v2 = vmul.f32 %v2621_v0, %v1556_v1  ;;  %v1579_v60 = vmul.f32 %v2645_v36, %v1556_v1  ;;  %v1578_v0 = vmul.f32 %v2650_v30, %v2803_v38  ;;  %v1601_v36 = vmul.f32 %v2629_v17, %v2787_v27 }
 0xa7b   :  { %v1620_v17 = vmul.f32 %v2650_v30, %v2797_v63 }
 0xa7f   :  { %v1521_v3 = vpop.f32.mrf.mxu0 }
 0xa80   :  { %2005 = vmatmul.msk.bf16.vlgmr.msra.gmra.mxu3 %vm293_vm6, %v2774_v32 }
 0xa82   :  { %1607 = vrot.lane.b32.xlu2 %v1551_v58, %s2216_s7  ;;  %v1386_v58 = vpack.c.bf16 %v2833_v37, %v2833_v37 }
 0xa90   :  { %2006 = vmatmul.msk.bf16.gmra.mxu3 %vm293_vm6, %v2381_v57 }
 0xaa4   :  { %v1566_v12 = vpop.permute.xlu2 %1565 }
 0xaa5   :  { %v2808_v24 = vmul.f32 %v1566_v12, %v1559_v61  ;;  %v1580_v25 = vmul.f32 %v1577_v20, %v1566_v12  ;;  %v1446_v61 = vsel %vm300_vm5, %v1386_v58, 0 }
 0xaa6   :  { %1458 = vmatpush.bf16.msrb.mxu1 %v1446_v61 }
 0xaa7   :  { %1586 = vrot.lane.b32.xlu2 %v1580_v25, %s2217_s8 }
 0xaa9   :  { %2001 = vmatmul.msk.bf16.vlgmr.msrb.gmra.mxu1 %vm293_vm6, %v2737_v31 }
 0xaaa   :  { %1530 = vmatpush.bf16.msra.mxu1 %v1446_v61 }
 0xaac   :  { %v1568_v28 = vpop.permute.xlu2 %1567 }
 0xaad   :  { %v2813_v53 = vmul.f32 %v1568_v28, %v1560_v26  ;;  %v1581_v20 = vmul.f32 %v1578_v0, %v1568_v28 }
 0xab4   :  { %v1570_v50 = vpop.permute.xlu2 %1569 }
 0xab5   :  { %v2817_v44 = vmul.f32 %v1570_v50, %v1561_v2  ;;  %v1582_v45 = vmul.f32 %v1579_v60, %v1570_v50 }
 0xab7   :  { %1590 = vrot.lane.b32.xlu0 %v1582_v45, %s2217_s8 }
 0xab9   :  { %2002 = vmatmul.msk.bf16.gmra.mxu1 %vm293_vm6, %v2366_v47 }
 0xac9   :  { %2009 = vmatmul.msk.bf16.vlgmr.msra.gmra.mxu1 %vm293_vm6, %v2763_v42 }
 0xad4   :  { %v1612_v23 = vpop.permute.xlu2 %1611 }
 0xad5   :  { %v1618_v1 = vmul.f32 %v1612_v23, %v1603_v40  ;;  %v1624_v3 = vmul.f32 %v1621_v52, %v1612_v23 }
 0xad7   :  { %1632 = vrot.lane.b32.xlu2 %v1624_v3, %s2217_s8 }
 0xad9   :  { %2010 = vmatmul.msk.bf16.gmra.mxu1 %vm293_vm6, %v2409_v4 }
 0xadc   :  { %v1608_v62 = vpop.permute.xlu2 %1607 }
 0xadd   :  { %v1616_v12 = vmul.f32 %v1608_v62, %v1601_v36  ;;  %v1622_v25 = vmul.f32 %v1619_v10, %v1608_v62 }
 0xadf   :  { %1588 = vrot.lane.b32.xlu2 %v1581_v20, %s2217_s8  ;;  %1628 = vrot.lane.b32.xlu0 %v1622_v25, %s2217_s8 }
 0xae4   :  { %v1610_v38 = vpop.permute.xlu1 %1609 }
 0xae5   :  { %v1623_v26 = vmul.f32 %v1620_v17, %v1610_v38 }
 0xae7   :  { %1630 = vrot.lane.b32.xlu1 %v1623_v26, %s2217_s8 }
 0xb01   :  { %v1587_v30 = vpop.permute.xlu2 %1586 }
 0xb02   :  { %v1595_v27 = vmax.f32 %v2808_v24, %v1587_v30  ;;  %v1418_v24 = vpop.f32.mrf.mxu3 }
 0xb04   :  { %v1598_v28 = vmax.f32 %v1595_v27, 0.0 }
 0xb06   :  { %1645 = vperm.xlu1 %2061, %v1598_v28  }
 0xb0a   :  { %v1420_v54 = vpop.f32.mrf.mxu3 }
 0xb12   :  { %v1423_v5 = vpop.f32.mrf.mxu3 }
 0xb1a   :  { %v1425_v14 = vpop.f32.mrf.mxu3 }
 0xb22   :  { %v1496_v29 = vpop.f32.mrf.mxu3 }
 0xb26   :  { %v1460_v16 = vpop.f32.mrf.mxu1 }
 0xb27   :  { %v1461_v20 = vadd.f32 %v1460_v16, %v1418_v24 }
 0xb29   :  { %v1591_v39 = vpop.permute.xlu0 %1590 }
 0xb2a   :  { %v1597_v41 = vmax.f32 %v2817_v44, %v1591_v39  ;;  %v1617_v44 = vmul.f32 %v1610_v38, %v1602_v13  ;;  %v1498_v52 = vpop.f32.mrf.mxu3 }
 0xb2c   :  { %v1600_v2 = vmax.f32 %v1597_v41, 0.0 }
 0xb2e   :  { %1655 = vperm.xlu2 %2059, %v1600_v2   ;;  %v1462_v11 = vpop.f32.mrf.mxu1 }
 0xb2f   :  { %v1463_v25 = vadd.f32 %v1462_v11, %v1420_v54 }
 0xb31   :  { %v1633_v60 = vpop.permute.xlu2 %1632 }
 0xb32   :  { %v1639_v50 = vmax.f32 %v1618_v1, %v1633_v60  ;;  %v1501_v63 = vpop.f32.mrf.mxu3 }
 0xb34   :  { %v1642_v45 = vmax.f32 %v1639_v50, 0.0 }
 0xb36   :  { %1675 = vperm.xlu0 %2060, %v1642_v45  }
 0xb39   :  { %v1589_v33 = vpop.permute.xlu2 %1588 }
 0xb3a   :  { %v1596_v35 = vmax.f32 %v2813_v53, %v1589_v33  ;;  %v1465_v53 = vpop.f32.mrf.mxu1  ;;  %v1503_v10 = vpop.f32.mrf.mxu3 }
 0xb3b   :  { %v1466_v18 = vadd.f32 %v1465_v53, %v1423_v5 }
 0xb3c   :  { %v1599_v46 = vmax.f32 %v1596_v35, 0.0 }
 0xb3e   :  { %1650 = vperm.xlu2 %2059, %v1599_v46  }
 0xb42   :  { %v1467_v34 = vpop.f32.mrf.mxu1 }
 0xb4a   :  { %v1532_v15 = vpop.f32.mrf.mxu1 }
 0xb4b   :  { %v1533_v40 = vadd.f32 %v1532_v15, %v1496_v29 }
 0xb51   :  { %v1629_v6 = vpop.permute.xlu0 %1628 }
 0xb52   :  { %v1637_v7 = vmax.f32 %v1616_v12, %v1629_v6  ;;  %v1534_v23 = vpop.f32.mrf.mxu1 }
 0xb53   :  { %v1535_v1 = vadd.f32 %v1534_v23, %v1498_v52 }
 0xb54   :  { %v1640_v49 = vmax.f32 %v1637_v7, 0.0 }
 0xb56   :  { %1665 = vperm.xlu1 %2061, %v1640_v49  }
 0xb59   :  { %v1631_v22 = vpop.permute.xlu1 %1630 }
 0xb5a   :  { %v1638_v55 = vmax.f32 %v1617_v44, %v1631_v22  ;;  %v1537_v58 = vpop.f32.mrf.mxu1 }
 0xb5b   :  { %v1538_v30 = vadd.f32 %v1537_v58, %v1501_v63 }
 0xb5c   :  { %v1641_v51 = vmax.f32 %v1638_v55, 0.0 }
 0xb5e   :  { %1670 = vperm.xlu2 %2059, %v1641_v51  }
 0xb62   :  { %v1539_v62 = vpop.f32.mrf.mxu1 }
 0xb78   :  { %v2873_v12 = vpop.permute.xlu1 %1645 }
 0xb79   :  { %v1658_v38 = vmul.f32 %v2873_v12, %v1461_v20 }
 0xb88   :  { %v2869_v3 = vpop.permute.xlu2 %1655 }
 0xb89   :  { %v1660_v61 = vmul.f32 %v2869_v3, %v1466_v18 }
 0xb8b   :  { %v1662_v0 = vpack.c.bf16 %v1660_v61, %v1660_v61 }
 0xb8d   :  { %v1700_v36 = vsel %vm300_vm5, %v1662_v0, 0 }
 0xb8e   :  { %1708 = vmatpush.bf16.msrb.mxu0 %v1700_v36  ;;  %1734 = vmatpush.bf16.msra.mxu2 %v1700_v36 }
 0xb98   :  { %v2875_v17 = vpop.permute.xlu2 %1650 }
 0xb99   :  { %v1659_v26 = vmul.f32 %v2875_v17, %v1463_v25 }
 0xb9b   :  { %v1661_v48 = vpack.c.bf16 %v1659_v26, %v1658_v38 }
 0xb9d   :  { %1709 = vmatpush.bf16.msrb.mxu0 %v1661_v48  ;;  %1735 = vmatpush.bf16.msra.mxu2 %v1661_v48 }
 0xba0   :  { %2014 = vmatmul.msk.bf16.vlgmr.msrb.gmra.mxu0 %vm581_vm2, %v2482_v8  ;;  %2016 = vmatmul.msk.bf16.vlgmr.msra.gmra.mxu2 %vm581_vm2, %v2694_v19 }
 0xba8   :  { %v2883_v27 = vpop.permute.xlu0 %1675 }
 0xba9   :  { %v1680_v28 = vmul.f32 %v2883_v27, %v1538_v30 }
 0xbab   :  { %v1682_v39 = vpack.c.bf16 %v1680_v28, %v1680_v28 }
 0xbad   :  { %v1684_v41 = vsel %vm300_vm5, %v1682_v39, 0 }
 0xbae   :  { %1692 = vmatpush.bf16.msrb.mxu3 %v1684_v41  ;;  %1721 = vmatpush.bf16.msrb.mxu1 %v1684_v41 }
 0xbb8   :  { %v2887_v2 = vpop.permute.xlu2 %1670 }
 0xbb9   :  { %v1679_v50 = vmul.f32 %v2887_v2, %v1535_v1 }
 0xbc8   :  { %v2889_v60 = vpop.permute.xlu1 %1665 }
 0xbc9   :  { %v1678_v45 = vmul.f32 %v2889_v60, %v1533_v40 }
 0xbcb   :  { %v1681_v33 = vpack.c.bf16 %v1679_v50, %v1678_v45 }
 0xbcd   :  { %1693 = vmatpush.bf16.msrb.mxu3 %v1681_v33  ;;  %1722 = vmatpush.bf16.msrb.mxu1 %v1681_v33 }
 0xbd0   :  { %2013 = vmatmul.msk.bf16.vlgmr.msrb.gmra.mxu3 %vm581_vm2, %v2698_v59  ;;  %2015 = vmatmul.msk.bf16.vlgmr.msrb.gmra.mxu1 %vm581_vm2, %v2690_v43 }
 0xc1d   :  { %v1711_v35 = vpop.f32.mrf.mxu0 }
 0xc23   :  { %v1737_v46 = vpop.f32.mrf.mxu2 }
 0xc25   :  { %v1713_v24 = vpop.f32.mrf.mxu0 }
 0xc2b   :  { %v1739_v6 = vpop.f32.mrf.mxu2 }
 0xc4d   :  { %v1724_v7 = vpop.f32.mrf.mxu1 }
 0xc4e   :  { %v1738_v49 = vadd.f32 %v1737_v46, %v1724_v7 }
 0xc50   :  { %vm1744_vm3 = vcmp.ge.f32.partialorder %v1738_v49, 0.0  ;;  %v1745_v13 = vmul.f32 0.01, %v1738_v49 }
 0xc52   :  { %v2897_v44 = vsel %vm1744_vm3, %v1738_v49, %v1745_v13 }
 0xc53   :  { %v1695_v16 = vpop.f32.mrf.mxu3  ;;  %v1748_v22 = vpack.c.bf16 %v2897_v44, %v2897_v44 }
 0xc54   :  { %v1712_v54 = vadd.f32 %v1711_v35, %v1695_v16 }
 0xc55   :  { %v1726_v55 = vpop.f32.mrf.mxu1  ;;  %v1750_v51 = vsel %vm300_vm5, %v1748_v22, 0 }
 0xc56   :  { %vm1741_vm4 = vcmp.ge.f32.partialorder %v1712_v54, 0.0  ;;  %v1742_v11 = vmul.f32 0.01, %v1712_v54  ;;  %1759 = vmatpush.bf16.msra.mxu3 %v1750_v51  ;;  %1798 = vmatpush.bf16.msra.mxu1 %v1750_v51 }
 0xc58   :  { %v2902_v5 = vsel %vm1741_vm4, %v1712_v54, %v1742_v11 }
 0xc59   :  { %2017 = vmatmul.msk.bf16.vlgmr.msra.gmra.mxu3 %vm293_vm6, %v2756_v21  ;;  %v1747_v53 = vpack.c.bf16 %v2902_v5, %v2902_v5  ;;  %2021 = vmatmul.msk.bf16.vlgmr.msra.gmra.mxu1 %vm293_vm6, %v2774_v32  ;;  %v1901_v7 = vadd.f32 %v2902_v5, %v2833_v37 }
 0xc5b   :  { %v1697_v14 = vpop.f32.mrf.mxu3  ;;  %v1771_v34 = vsel %vm300_vm5, %v1747_v53, 0 }
 0xc5c   :  { %1780 = vmatpush.bf16.msra.mxu0 %v1771_v34  ;;  %1816 = vmatpush.bf16.msrb.mxu2 %v1771_v34 }
 0xc5f   :  { %2019 = vmatmul.msk.bf16.vlgmr.msra.gmra.mxu0 %vm293_vm6, %v2737_v31  ;;  %2023 = vmatmul.msk.bf16.vlgmr.msrb.gmra.mxu2 %vm293_vm6, %v2763_v42 }
 0xc69   :  { %2018 = vmatmul.msk.bf16.gmra.mxu3 %vm293_vm6, %v2379_v56  ;;  %2022 = vmatmul.msk.bf16.gmra.mxu1 %vm293_vm6, %v2381_v57 }
 0xc6f   :  { %2020 = vmatmul.msk.bf16.gmra.mxu0 %vm293_vm6, %v2366_v47  ;;  %2024 = vmatmul.msk.bf16.gmra.mxu2 %vm293_vm6, %v2409_v4 }
 0xcd6   :  { %v1800_v21 = vpop.f32.mrf.mxu1 }
 0xcdc   :  { %v1761_v32 = vpop.f32.mrf.mxu3  ;;  %v1782_v29 = vpop.f32.mrf.mxu0 }
 0xcdd   :  { %v1783_v47 = vadd.f32 %v1782_v29, %v1761_v32 }
 0xcde   :  { %v1802_v15 = vpop.f32.mrf.mxu1 }
 0xcdf   :  { %v1827_v62 = vmul.f32 %v1783_v47, %v2873_v12 }
 0xce2   :  { %v1818_v31 = vpop.f32.mrf.mxu2 }
 0xce3   :  { %v1819_v48 = vadd.f32 %v1818_v31, %v1800_v21 }
 0xce4   :  { %v1763_v40 = vpop.f32.mrf.mxu3  ;;  %v1784_v52 = vpop.f32.mrf.mxu0 }
 0xce5   :  { %v1785_v63 = vadd.f32 %v1784_v52, %v1763_v40  ;;  %v1832_v39 = vmul.f32 %v1819_v48, %v2889_v60 }
 0xce6   :  { %v1805_v42 = vpop.f32.mrf.mxu1 }
 0xce7   :  { %v1828_v4 = vmul.f32 %v1785_v63, %v2875_v17 }
 0xce9   :  { %v1830_v30 = vpack.c.bf16 %v1828_v4, %v1827_v62 }
 0xcea   :  { %v1820_v23 = vpop.f32.mrf.mxu2 }
 0xceb   :  { %v1821_v20 = vadd.f32 %v1820_v23, %v1802_v15 }
 0xcec   :  { %v1766_v1 = vpop.f32.mrf.mxu3  ;;  %v1787_v56 = vpop.f32.mrf.mxu0 }
 0xced   :  { %v1788_v18 = vadd.f32 %v1787_v56, %v1766_v1  ;;  %v1833_v28 = vmul.f32 %v1821_v20, %v2887_v2 }
 0xcee   :  { %v1807_v57 = vpop.f32.mrf.mxu1 }
 0xcef   :  { %v1829_v58 = vmul.f32 %v1788_v18, %v2869_v3  ;;  %v1835_v12 = vpack.c.bf16 %v1833_v28, %v1832_v39 }
 0xcf1   :  { %v1831_v61 = vpack.c.bf16 %v1829_v58, %v1829_v58 }
 0xcf2   :  { %v1823_v0 = vpop.f32.mrf.mxu2 }
 0xcf3   :  { %v1824_v36 = vadd.f32 %v1823_v0, %v1805_v42  ;;  %v1854_v10 = vsel %vm300_vm5, %v1831_v61, 0 }
 0xcf4   :  { %v1768_v25 = vpop.f32.mrf.mxu3  ;;  %v1789_v38 = vpop.f32.mrf.mxu0  ;;  %1862 = vmatpush.bf16.msrb.mxu0 %v1854_v10  ;;  %1888 = vmatpush.bf16.msra.mxu2 %v1854_v10 }
 0xcf5   :  { %v1834_v26 = vmul.f32 %v1824_v36, %v2883_v27 }
 0xcf7   :  { %v1836_v3 = vpack.c.bf16 %v1834_v26, %v1834_v26 }
 0xcf8   :  { %1863 = vmatpush.bf16.msrb.mxu0 %v1830_v30  ;;  %1889 = vmatpush.bf16.msra.mxu2 %v1830_v30 }
 0xcf9   :  { %v1838_v17 = vsel %vm300_vm5, %v1836_v3, 0 }
 0xcfa   :  { %v1825_v41 = vpop.f32.mrf.mxu2  ;;  %1846 = vmatpush.bf16.msrb.mxu3 %v1838_v17  ;;  %1875 = vmatpush.bf16.msrb.mxu1 %v1838_v17 }
 0xcfb   :  { %2026 = vmatmul.msk.bf16.vlgmr.msrb.gmra.mxu0 %vm581_vm2, %v2482_v8  ;;  %2028 = vmatmul.msk.bf16.vlgmr.msra.gmra.mxu2 %vm581_vm2, %v2694_v19  ;;  %v1903_v8 = vadd.f32 %v2897_v44, %v2821_v9 }
 0xcfe   :  { %1847 = vmatpush.bf16.msrb.mxu3 %v1835_v12  ;;  %1876 = vmatpush.bf16.msrb.mxu1 %v1835_v12 }
 0xd01   :  { %2025 = vmatmul.msk.bf16.vlgmr.msrb.gmra.mxu3 %vm581_vm2, %v2698_v59  ;;  %2027 = vmatmul.msk.bf16.vlgmr.msrb.gmra.mxu1 %vm581_vm2, %v2690_v43 }
 0xd78   :  { %v1865_v27 = vpop.f32.mrf.mxu0 }
 0xd7e   :  { %v1878_v2 = vpop.f32.mrf.mxu1  ;;  %v1891_v60 = vpop.f32.mrf.mxu2 }
 0xd7f   :  { %v1892_v50 = vadd.f32 %v1891_v60, %v1878_v2 }
 0xd80   :  { %v1867_v45 = vpop.f32.mrf.mxu0 }
 0xd81   :  { %vm1898_vm5 = vcmp.ge.f32.partialorder %v1892_v50, 0.0  ;;  %v1899_v33 = vmul.f32 0.01, %v1892_v50 }
 0xd83   :  { %v1900_v19 = vsel %vm1898_vm5, %v1892_v50, %v1899_v33 }
 0xd84   :  { %v1904_v35 = vadd.f32 %v1903_v8, %v1900_v19  ;;  %v1849_v46 = vpop.f32.mrf.mxu3 }
 0xd85   :  { %v1866_v24 = vadd.f32 %v1865_v27, %v1849_v46 }
 0xd86   :  { %1906 = vst [vmem:[#allocation7 + $0x18] sm:$0xff] %v1904_v35  ;;  %v1880_v6 = vpop.f32.mrf.mxu1  ;;  %v1893_v59 = vpop.f32.mrf.mxu2 }
 0xd87   :  { %vm1895_vm6 = vcmp.ge.f32.partialorder %v1866_v24, 0.0  ;;  %v1896_v43 = vmul.f32 0.01, %v1866_v24 }
 0xd89   :  { %v1897_v49 = vsel %vm1895_vm6, %v1866_v24, %v1896_v43 }
 0xd8a   :  { %v1902_v9 = vadd.f32 %v1901_v7, %v1897_v49 }
 0xd8c   :  { %1905 = vst [vmem:[#allocation7] sm:$0xff] %v1902_v9  ;;  %v1851_v13 = vpop.f32.mrf.mxu3 }
 0xd8d   :  { %1923 = dma.vmem_to_hbm [thread:$0]  %s1916_s20, 768, %s1918_s23, [#allocation4], %s2220_s24, %s2220_s24, %s2221_s2  }
 0xd8e   :  { %2208 = dma.done.wait [#allocation4], 768  }
 0xd8f   :  { %2209 = vsyncadd [#allocation4], 4294966528 }
 0xd90   :  { %1928 = vsyncpa [#allocation3], 1 }
 0xd91   :  { %1929 = vsyncpa [#allocation6], 1 }
 0xd92   :  { %1930 = vsyncpa [#allocation4], 1 }

</bundles_post_ra>
